<compile_context>
chip_gen: v5e
topology: v5e:2x2
jax: 0.10.0
libtpu: 0.0.40
codegen_flags: <defaults>
</compile_context>

<pallas_src>
import functools

import jax
import jax.numpy as jnp
from jax.experimental import pallas as pl
from jax.experimental.pallas import tpu as pltpu

NEG_SLOPE = 0.01  # F.leaky_relu default


def _leaky_relu(x):
    return jnp.where(x >= 0, x, NEG_SLOPE * x)


def _round_up(v, m):
    return ((v + m - 1) // m) * m


# ---------------------------------------------------------------------------
# Fused kernel: one grid step = `Bt` batch elements, full forward pass.
# ---------------------------------------------------------------------------
def _epic_fused_kernel(x_ref, msel_ref, bcast_ref,
                       wl1_ref, bl1_ref, wl2_ref, bl2_ref,
                       g1w_ref, g1b_ref, g2w_ref, g2b_ref,
                       eg1p_ref, eg1g_ref, eg1b_ref, eg2w_ref, eg2b_ref,
                       el1w_ref, el1g_ref, el1b_ref, el2w_ref, el2b_ref,
                       g3p_ref, g3g_ref, g3b_ref, g4w_ref, g4b_ref,
                       g5w_ref, g5b_ref,
                       out_ref, *, num_epic):
    f32 = jnp.float32
    cd = x_ref.dtype                     # dtype of the heavy MXU operands

    x = x_ref[...]                       # [R, F_pad]     (R = Bt * N_pad)
    msel = msel_ref[...]                 # [Btp, R]  mask-folded row selector
    bcast = bcast_ref[...]               # [R, Btp]  one-hot batch->row bcast

    # ---- per-point embedding MLP: fc_l1, fc_l2 (+ residual) ----------------
    h1 = _leaky_relu(jnp.dot(x, wl1_ref[...], preferred_element_type=f32)
                     + bl1_ref[...])                          # [R, Hp] f32
    xl = _leaky_relu(jnp.dot(h1.astype(cd), wl2_ref[...],
                             preferred_element_type=f32)
                     + bl2_ref[...] + h1)                     # [R, Hp] f32

    # masked per-batch pooled sum over points (MXU reduction)
    S = jnp.dot(msel, xl, preferred_element_type=f32)         # [Btp, Hp]

    # ---- tiny global path: fc_g1 (1/N and sum_scale folded), fc_g2 ---------
    xg = _leaky_relu(jnp.dot(S, g1w_ref[...], preferred_element_type=f32)
                     + g1b_ref[...])
    xg = _leaky_relu(jnp.dot(xg, g2w_ref[...], preferred_element_type=f32)
                     + g2b_ref[...])                          # [Btp, Lp]

    # ---- EPiC layers (statically unrolled; weights resident in VMEM) -------
    for l in range(num_epic):
        # global update
        xg1 = _leaky_relu(
            jnp.dot(S, eg1p_ref[l], preferred_element_type=f32)
            + jnp.dot(xg, eg1g_ref[l], preferred_element_type=f32)
            + eg1b_ref[l])
        xg = _leaky_relu(jnp.dot(xg1, eg2w_ref[l], preferred_element_type=f32)
                         + eg2b_ref[l] + xg)
        # local update: per-batch global injection + bias, broadcast to rows
        gb = jnp.dot(xg, el1g_ref[l], preferred_element_type=f32) + el1b_ref[l]
        gb_rows = jnp.dot(bcast, gb, preferred_element_type=f32)   # [R, Hp]
        h1 = _leaky_relu(jnp.dot(xl.astype(cd), el1w_ref[l],
                                 preferred_element_type=f32) + gb_rows)
        xl = _leaky_relu(jnp.dot(h1.astype(cd), el2w_ref[l],
                                 preferred_element_type=f32)
                         + el2b_ref[l] + xl)
        S = jnp.dot(msel, xl, preferred_element_type=f32)

    # ---- final global head: fc_g3, fc_g4 (+res), fc_g5 ---------------------
    o = _leaky_relu(jnp.dot(S, g3p_ref[...], preferred_element_type=f32)
                    + jnp.dot(xg, g3g_ref[...], preferred_element_type=f32)
                    + g3b_ref[...])
    o = _leaky_relu(jnp.dot(o, g4w_ref[...], preferred_element_type=f32)
                    + g4b_ref[...] + o)
    out_ref[...] = (jnp.dot(o, g5w_ref[...], preferred_element_type=f32)
                    + g5b_ref[...]).astype(out_ref.dtype)


# ---------------------------------------------------------------------------
# Wrapper: padding, weight folding, tiling choice, pallas_call.
# ---------------------------------------------------------------------------
def epic_discriminator_forward(x, mask, params, *, sum_scale=0.01,
                               compute_dtype=jnp.bfloat16, target_rows=1024):
    B, N, F = x.shape
    H = params['fc_l1'][0].shape[0]
    latent = params['fc_g2'][0].shape[0]
    L = len(params['epic'])
    n_points = float(N)      # PyTorch's (x*mask).mean(1) divides by the real N

    f32 = jnp.float32
    Hp = _round_up(H, 128)
    Lp = _round_up(latent, 128)
    Op = 128                 # fc_g5 (1 output) padded to a lane-dense width
    F_pad = _round_up(F, 8)

    # --- tiling: flat point rows per grid step, minimal padding -------------
    N_pad = _round_up(max(N, 1), 8)
    Bt = max(1, min(B, target_rows // N_pad))
    if B >= 2:
        Bt = min(Bt, (B + 1) // 2)   # keep >=2 grid steps (both v7x TCs busy)
    B_pad = _round_up(B, Bt)
    G = B_pad // Bt
    R = Bt * N_pad                   # point rows per grid step
    Btp = _round_up(Bt, 8)           # sublane-aligned per-step batch rows

    # --- padded / folded weights (layout: [in, out]) -------------------------
    def pad_w(w, r, c, dt):
        return jnp.pad(w, ((0, r - w.shape[0]), (0, c - w.shape[1]))).astype(dt)

    def pad_b(b, c):
        return jnp.pad(b, (0, c - b.shape[0])).reshape(1, c).astype(f32)

    w_l1, b_l1 = params['fc_l1']
    w_l2, b_l2 = params['fc_l2']
    wl1 = pad_w(w_l1.T, F_pad, Hp, compute_dtype)
    bl1 = pad_b(b_l1, Hp)
    wl2 = pad_w(w_l2.T, Hp, Hp, compute_dtype)
    bl2 = pad_b(b_l2, Hp)

    w_g1, b_g1 = params['fc_g1']
    w_g2, b_g2 = params['fc_g2']
    w_g1t = w_g1.T                                    # [2H, H]
    g1w = pad_w(w_g1t[:H] / n_points + w_g1t[H:] * sum_scale, Hp, Hp, f32)
    g1b = pad_b(b_g1, Hp)
    g2w = pad_w(w_g2.T, Hp, Lp, f32)
    g2b = pad_b(b_g2, Lp)

    eg1p, eg1g, eg1b, eg2w, eg2b = [], [], [], [], []
    el1w, el1g, el1b, el2w, el2b = [], [], [], [], []
    for lp in params['epic']:
        wG1, bG1 = lp['fc_global1']
        wG2, bG2 = lp['fc_global2']
        wL1, bL1 = lp['fc_local1']
        wL2, bL2 = lp['fc_local2']
        wG1t, wL1t = wG1.T, wL1.T                     # [2H+lat, H], [H+lat, H]
        eg1p.append(pad_w(wG1t[:H] / n_points + wG1t[H:2 * H] * sum_scale,
                          Hp, Hp, f32))
        eg1g.append(pad_w(wG1t[2 * H:], Lp, Hp, f32))
        eg1b.append(pad_b(bG1, Hp))
        eg2w.append(pad_w(wG2.T, Hp, Lp, f32))
        eg2b.append(pad_b(bG2, Lp))
        el1w.append(pad_w(wL1t[:H], Hp, Hp, compute_dtype))
        el1g.append(pad_w(wL1t[H:], Lp, Hp, f32))
        el1b.append(pad_b(bL1, Hp))
        el2w.append(pad_w(wL2.T, Hp, Hp, compute_dtype))
        el2b.append(pad_b(bL2, Hp))
    if L == 0:   # dummy (unused) stack entries so input ranks stay fixed
        eg1p = [jnp.zeros((Hp, Hp), f32)]
        eg1g = [jnp.zeros((Lp, Hp), f32)]
        eg1b = [jnp.zeros((1, Hp), f32)]
        eg2w = [jnp.zeros((Hp, Lp), f32)]
        eg2b = [jnp.zeros((1, Lp), f32)]
        el1w = [jnp.zeros((Hp, Hp), compute_dtype)]
        el1g = [jnp.zeros((Lp, Hp), f32)]
        el1b = [jnp.zeros((1, Hp), f32)]
        el2w = [jnp.zeros((Hp, Hp), compute_dtype)]
        el2b = [jnp.zeros((1, Hp), f32)]
    stk = lambda ts: jnp.stack(ts, axis=0)
    eg1p, eg1g, eg1b, eg2w, eg2b = map(stk, (eg1p, eg1g, eg1b, eg2w, eg2b))
    el1w, el1g, el1b, el2w, el2b = map(stk, (el1w, el1g, el1b, el2w, el2b))

    w_g3, b_g3 = params['fc_g3']
    w_g4, b_g4 = params['fc_g4']
    w_g5, b_g5 = params['fc_g5']
    w_g3t = w_g3.T
    g3p = pad_w(w_g3t[:H] / n_points + w_g3t[H:2 * H] * sum_scale, Hp, Hp, f32)
    g3g = pad_w(w_g3t[2 * H:], Lp, Hp, f32)
    g3b = pad_b(b_g3, Hp)
    g4w = pad_w(w_g4.T, Hp, Hp, f32)
    g4b = pad_b(b_g4, Hp)
    g5w = pad_w(w_g5.T, Hp, Op, f32)
    g5b = pad_b(b_g5, Op)

    # --- activations / mask in flat row layout -------------------------------
    xp = jnp.pad(x, ((0, B_pad - B), (0, N_pad - N), (0, F_pad - F)))
    x_flat = xp.reshape(B_pad * N_pad, F_pad).astype(compute_dtype)
    mp = jnp.pad(mask.astype(f32), ((0, B_pad - B), (0, N_pad - N), (0, 0)))
    m_row = mp.reshape(G, 1, R)                                   # [G, 1, R]
    batch_of_row = jnp.repeat(jnp.arange(Bt, dtype=jnp.int32), N_pad)  # [R]
    onehot = (jnp.arange(Btp, dtype=jnp.int32)[:, None]
              == batch_of_row[None, :]).astype(f32)               # [Btp, R]
    msel = onehot[None, :, :] * m_row                             # [G, Btp, R]
    bcast = onehot.T                                              # [R, Btp]

    def resident(arr):
        nd = arr.ndim
        return pl.BlockSpec(arr.shape, lambda g, _z=(0,) * nd: _z)

    weights = (wl1, bl1, wl2, bl2, g1w, g1b, g2w, g2b,
               eg1p, eg1g, eg1b, eg2w, eg2b,
               el1w, el1g, el1b, el2w, el2b,
               g3p, g3g, g3b, g4w, g4b, g5w, g5b)

    in_specs = ([pl.BlockSpec((R, F_pad), lambda g: (g, 0)),
                 pl.BlockSpec((pl.Squeezed(), Btp, R), lambda g: (g, 0, 0)),
                 resident(bcast)]
                + [resident(w) for w in weights])

    out3 = pl.pallas_call(
        functools.partial(_epic_fused_kernel, num_epic=L),
        grid=(G,),
        in_specs=in_specs,
        out_specs=pl.BlockSpec((pl.Squeezed(), Btp, Op), lambda g: (g, 0, 0)),
        out_shape=jax.ShapeDtypeStruct((G, Btp, Op), f32),
        compiler_params=pltpu.CompilerParams(
            dimension_semantics=("parallel",),
            vmem_limit_bytes=48 * 1024 * 1024,
        ),
    )(x_flat, msel, bcast, *weights)

    return out3[:, :Bt, :].reshape(B_pad, Op)[:B, :1]


# ---------------------------------------------------------------------------
# Synthetic weight-norm parameters + plain-JAX reference (mirrors PyTorch).
# ---------------------------------------------------------------------------
def weight_norm_params(key, out_dim, in_dim):
    """Deterministic synthetic Linear params with weight_norm (dim=0) applied."""
    kv, kg, kb = jax.random.split(key, 3)
    v = jax.random.normal(kv, (out_dim, in_dim), jnp.float32) * 0.1
    g = jax.random.uniform(kg, (out_dim,), jnp.float32, 0.5, 1.5)
    b = jax.random.normal(kb, (out_dim,), jnp.float32) * 0.05
    norm = jnp.sqrt(jnp.sum(v * v, axis=1, keepdims=True))
    w = g[:, None] * v / norm                     # effective weight [out, in]
    return w, b


def make_params(key, *, feats, hid_d, latent, epic_layers):
    keys = jax.random.split(key, 7 + 4 * epic_layers)
    it = iter(keys)
    nxt = lambda: next(it)
    params = {
        'fc_l1': weight_norm_params(nxt(), hid_d, feats),
        'fc_l2': weight_norm_params(nxt(), hid_d, hid_d),
        'fc_g1': weight_norm_params(nxt(), hid_d, 2 * hid_d),
        'fc_g2': weight_norm_params(nxt(), latent, hid_d),
        'epic': [],
    }
    for _ in range(epic_layers):
        params['epic'].append({
            'fc_global1': weight_norm_params(nxt(), hid_d, 2 * hid_d + latent),
            'fc_global2': weight_norm_params(nxt(), latent, hid_d),
            'fc_local1': weight_norm_params(nxt(), hid_d, hid_d + latent),
            'fc_local2': weight_norm_params(nxt(), hid_d, hid_d),
        })
    params['fc_g3'] = weight_norm_params(nxt(), hid_d, 2 * hid_d + latent)
    params['fc_g4'] = weight_norm_params(nxt(), hid_d, hid_d)
    params['fc_g5'] = weight_norm_params(nxt(), 1, hid_d)
    return params


def reference_forward(x, mask, params, *, sum_scale=0.01):
    """Plain-JAX replica of the PyTorch EPiC_discriminator_mask.forward."""
    def lin(p, v):
        w, b = p
        return v @ w.T + b
    lrelu = _leaky_relu
    x_local = lrelu(lin(params['fc_l1'], x))
    x_local = lrelu(lin(params['fc_l2'], x_local) + x_local)
    x_mean = jnp.mean(x_local * mask, axis=1)
    x_sum = jnp.sum(x_local * mask, axis=1) * sum_scale
    x_global = jnp.concatenate([x_mean, x_sum], axis=1)
    x_global = lrelu(lin(params['fc_g1'], x_global))
    x_global = lrelu(lin(params['fc_g2'], x_global))
    B, N, _ = x_local.shape
    for lp in params['epic']:
        pm = jnp.mean(x_local * mask, axis=1)
        ps = jnp.sum(x_local * mask, axis=1) * sum_scale
        cat = jnp.concatenate([pm, ps, x_global], axis=1)
        xg1 = lrelu(lin(lp['fc_global1'], cat))
        x_global = lrelu(lin(lp['fc_global2'], xg1) + x_global)
        g2l = jnp.broadcast_to(x_global[:, None, :], (B, N, x_global.shape[1]))
        catl = jnp.concatenate([x_local, g2l], axis=2)
        xl1 = lrelu(lin(lp['fc_local1'], catl))
        x_local = lrelu(lin(lp['fc_local2'], xl1) + x_local)
    x_mean = jnp.mean(x_local * mask, axis=1)
    x_sum = jnp.sum(x_local * mask, axis=1) * sum_scale
    cat = jnp.concatenate([x_mean, x_sum, x_global], axis=1)
    out = lrelu(lin(params['fc_g3'], cat))
    out = lrelu(lin(params['fc_g4'], out) + out)
    return lin(params['fc_g5'], out)


def _run_case(key, *, B, N, feats, hid_d, latent, epic_layers, sum_scale):
    k_x, k_m, k_p = jax.random.split(key, 3)
    x = jax.random.normal(k_x, (B, N, feats), jnp.float32)
    mask = (jax.random.uniform(k_m, (B, N, 1)) > 0.25).astype(jnp.float32)
    params = make_params(k_p, feats=feats, hid_d=hid_d, latent=latent,
                         epic_layers=epic_layers)
    ref = reference_forward(x, mask, params, sum_scale=sum_scale)

    # f32 operands: bit-close to the reference.
    fwd32 = jax.jit(functools.partial(epic_discriminator_forward,
                                      sum_scale=sum_scale,
                                      compute_dtype=jnp.float32))
    out32 = jax.block_until_ready(fwd32(x, mask, params))
    assert out32.shape == (B, 1)
    assert jnp.allclose(out32, ref, atol=1e-4, rtol=1e-4), (out32, ref)

    # Default bf16 MXU operands (f32 accumulation / elementwise): small drift
    # vs the f32 reference is expected, so use a looser tolerance.
    fwd16 = jax.jit(functools.partial(epic_discriminator_forward,
                                      sum_scale=sum_scale,
                                      compute_dtype=jnp.bfloat16))
    out16 = jax.block_until_ready(fwd16(x, mask, params))
    assert out16.shape == (B, 1)
    assert jnp.allclose(out16, ref, atol=5e-2, rtol=5e-2), (out16, ref)


if __name__ == "__main__":
    key = jax.random.PRNGKey(0)
    k1, k2 = jax.random.split(key)
    # Small shapes consistent with the module.
    _run_case(k1, B=2, N=8, feats=4, hid_d=32, latent=16, epic_layers=2,
              sum_scale=0.01)
    # Ragged shapes: exercises batch/point padding and Bt>1 row batching.
    _run_case(k2, B=3, N=13, feats=3, hid_d=32, latent=10, epic_layers=1,
              sum_scale=0.01)
    print("KERNEL_OK")
</pallas_src>

<mosaic_0001>
module attributes {stable_mosaic.version = 11 : i64} {
  func.func @_epic_fused_kernel(%arg0: i32, %arg1: memref<8x8xf32, #tpu.memory_space<vmem>>, %arg2: memref<1x8x8xf32, #tpu.memory_space<vmem>>, %arg3: memref<8x8xf32, #tpu.memory_space<vmem>>, %arg4: memref<8x128xf32, #tpu.memory_space<vmem>>, %arg5: memref<1x128xf32, #tpu.memory_space<vmem>>, %arg6: memref<128x128xf32, #tpu.memory_space<vmem>>, %arg7: memref<1x128xf32, #tpu.memory_space<vmem>>, %arg8: memref<128x128xf32, #tpu.memory_space<vmem>>, %arg9: memref<1x128xf32, #tpu.memory_space<vmem>>, %arg10: memref<128x128xf32, #tpu.memory_space<vmem>>, %arg11: memref<1x128xf32, #tpu.memory_space<vmem>>, %arg12: memref<2x128x128xf32, #tpu.memory_space<vmem>>, %arg13: memref<2x128x128xf32, #tpu.memory_space<vmem>>, %arg14: memref<2x1x128xf32, #tpu.memory_space<vmem>>, %arg15: memref<2x128x128xf32, #tpu.memory_space<vmem>>, %arg16: memref<2x1x128xf32, #tpu.memory_space<vmem>>, %arg17: memref<2x128x128xf32, #tpu.memory_space<vmem>>, %arg18: memref<2x128x128xf32, #tpu.memory_space<vmem>>, %arg19: memref<2x1x128xf32, #tpu.memory_space<vmem>>, %arg20: memref<2x128x128xf32, #tpu.memory_space<vmem>>, %arg21: memref<2x1x128xf32, #tpu.memory_space<vmem>>, %arg22: memref<128x128xf32, #tpu.memory_space<vmem>>, %arg23: memref<128x128xf32, #tpu.memory_space<vmem>>, %arg24: memref<1x128xf32, #tpu.memory_space<vmem>>, %arg25: memref<128x128xf32, #tpu.memory_space<vmem>>, %arg26: memref<1x128xf32, #tpu.memory_space<vmem>>, %arg27: memref<128x128xf32, #tpu.memory_space<vmem>>, %arg28: memref<1x128xf32, #tpu.memory_space<vmem>>, %arg29: memref<1x8x128xf32, #tpu.memory_space<vmem>>) attributes {dimension_semantics = [#tpu.dimension_semantics<parallel>], iteration_bounds = array<i64: 2>, scalar_prefetch = 0 : i64, scratch_operands = 0 : i64, tpu.core_type = #tpu.core_type<tc>, window_params = [{transform_indices = @transform_0, window_bounds = array<i64: 8, 8>}, {transform_indices = @transform_1, window_bounds = array<i64: 1, 8, 8>}, {pipeline_mode = #tpu.pipeline_mode<synchronous>, transform_indices = @transform_2, window_bounds = array<i64: 8, 8>}, {pipeline_mode = #tpu.pipeline_mode<synchronous>, transform_indices = @transform_3, window_bounds = array<i64: 8, 128>}, {pipeline_mode = #tpu.pipeline_mode<synchronous>, transform_indices = @transform_4, window_bounds = array<i64: 1, 128>}, {pipeline_mode = #tpu.pipeline_mode<synchronous>, transform_indices = @transform_5, window_bounds = array<i64: 128, 128>}, {pipeline_mode = #tpu.pipeline_mode<synchronous>, transform_indices = @transform_6, window_bounds = array<i64: 1, 128>}, {pipeline_mode = #tpu.pipeline_mode<synchronous>, transform_indices = @transform_7, window_bounds = array<i64: 128, 128>}, {pipeline_mode = #tpu.pipeline_mode<synchronous>, transform_indices = @transform_8, window_bounds = array<i64: 1, 128>}, {pipeline_mode = #tpu.pipeline_mode<synchronous>, transform_indices = @transform_9, window_bounds = array<i64: 128, 128>}, {pipeline_mode = #tpu.pipeline_mode<synchronous>, transform_indices = @transform_10, window_bounds = array<i64: 1, 128>}, {pipeline_mode = #tpu.pipeline_mode<synchronous>, transform_indices = @transform_11, window_bounds = array<i64: 2, 128, 128>}, {pipeline_mode = #tpu.pipeline_mode<synchronous>, transform_indices = @transform_12, window_bounds = array<i64: 2, 128, 128>}, {pipeline_mode = #tpu.pipeline_mode<synchronous>, transform_indices = @transform_13, window_bounds = array<i64: 2, 1, 128>}, {pipeline_mode = #tpu.pipeline_mode<synchronous>, transform_indices = @transform_14, window_bounds = array<i64: 2, 128, 128>}, {pipeline_mode = #tpu.pipeline_mode<synchronous>, transform_indices = @transform_15, window_bounds = array<i64: 2, 1, 128>}, {pipeline_mode = #tpu.pipeline_mode<synchronous>, transform_indices = @transform_16, window_bounds = array<i64: 2, 128, 128>}, {pipeline_mode = #tpu.pipeline_mode<synchronous>, transform_indices = @transform_17, window_bounds = array<i64: 2, 128, 128>}, {pipeline_mode = #tpu.pipeline_mode<synchronous>, transform_indices = @transform_18, window_bounds = array<i64: 2, 1, 128>}, {pipeline_mode = #tpu.pipeline_mode<synchronous>, transform_indices = @transform_19, window_bounds = array<i64: 2, 128, 128>}, {pipeline_mode = #tpu.pipeline_mode<synchronous>, transform_indices = @transform_20, window_bounds = array<i64: 2, 1, 128>}, {pipeline_mode = #tpu.pipeline_mode<synchronous>, transform_indices = @transform_21, window_bounds = array<i64: 128, 128>}, {pipeline_mode = #tpu.pipeline_mode<synchronous>, transform_indices = @transform_22, window_bounds = array<i64: 128, 128>}, {pipeline_mode = #tpu.pipeline_mode<synchronous>, transform_indices = @transform_23, window_bounds = array<i64: 1, 128>}, {pipeline_mode = #tpu.pipeline_mode<synchronous>, transform_indices = @transform_24, window_bounds = array<i64: 128, 128>}, {pipeline_mode = #tpu.pipeline_mode<synchronous>, transform_indices = @transform_25, window_bounds = array<i64: 1, 128>}, {pipeline_mode = #tpu.pipeline_mode<synchronous>, transform_indices = @transform_26, window_bounds = array<i64: 128, 128>}, {pipeline_mode = #tpu.pipeline_mode<synchronous>, transform_indices = @transform_27, window_bounds = array<i64: 1, 128>}, {transform_indices = @transform_28, window_bounds = array<i64: 1, 8, 128>}]} {
    %c0 = arith.constant 0 : index
    %c0_0 = arith.constant 0 : index
    %0 = vector.load %arg1[%c0, %c0_0] : memref<8x8xf32, #tpu.memory_space<vmem>>, vector<8x8xf32>
    %c0_1 = arith.constant 0 : index
    %c0_2 = arith.constant 0 : index
    %c0_3 = arith.constant 0 : index
    %1 = vector.load %arg2[%c0_1, %c0_2, %c0_3] : memref<1x8x8xf32, #tpu.memory_space<vmem>>, vector<1x8x8xf32>
    %2 = vector.shape_cast %1 : vector<1x8x8xf32> to vector<8x8xf32>
    %c0_4 = arith.constant 0 : index
    %c0_5 = arith.constant 0 : index
    %3 = vector.load %arg3[%c0_4, %c0_5] : memref<8x8xf32, #tpu.memory_space<vmem>>, vector<8x8xf32>
    %c0_6 = arith.constant 0 : index
    %c0_7 = arith.constant 0 : index
    %4 = vector.load %arg4[%c0_6, %c0_7] : memref<8x128xf32, #tpu.memory_space<vmem>>, vector<8x128xf32>
    %cst = arith.constant dense<0.000000e+00> : vector<8x128xf32>
    %5 = tpu.matmul %0, %4, %cst {dimension_numbers = #tpu.dot_dimension_numbers<[1], [0], [0], [1], [0, 0, 1, 1], [], []>} : vector<8x8xf32>, vector<8x128xf32>, vector<8x128xf32> -> vector<8x128xf32>
    %c0_8 = arith.constant 0 : index
    %c0_9 = arith.constant 0 : index
    %6 = vector.load %arg5[%c0_8, %c0_9] : memref<1x128xf32, #tpu.memory_space<vmem>>, vector<1x128xf32>
    %7 = vector.broadcast %6 : vector<1x128xf32> to vector<8x128xf32>
    %8 = arith.addf %5, %7 : vector<8x128xf32>
    %cst_10 = arith.constant 0.000000e+00 : f32
    %9 = vector.broadcast %cst_10 : f32 to vector<8x128xf32>
    %10 = arith.cmpf oge, %8, %9 : vector<8x128xf32>
    %cst_11 = arith.constant 0.00999999977 : f32
    %11 = vector.broadcast %cst_11 : f32 to vector<8x128xf32>
    %12 = arith.mulf %11, %8 : vector<8x128xf32>
    %13 = arith.select %10, %8, %12 : vector<8x128xi1>, vector<8x128xf32>
    %c0_12 = arith.constant 0 : index
    %c0_13 = arith.constant 0 : index
    %14 = vector.load %arg6[%c0_12, %c0_13] : memref<128x128xf32, #tpu.memory_space<vmem>>, vector<128x128xf32>
    %cst_14 = arith.constant dense<0.000000e+00> : vector<8x128xf32>
    %15 = tpu.matmul %13, %14, %cst_14 {dimension_numbers = #tpu.dot_dimension_numbers<[1], [0], [0], [1], [0, 0, 1, 1], [], []>} : vector<8x128xf32>, vector<128x128xf32>, vector<8x128xf32> -> vector<8x128xf32>
    %c0_15 = arith.constant 0 : index
    %c0_16 = arith.constant 0 : index
    %16 = vector.load %arg7[%c0_15, %c0_16] : memref<1x128xf32, #tpu.memory_space<vmem>>, vector<1x128xf32>
    %17 = vector.broadcast %16 : vector<1x128xf32> to vector<8x128xf32>
    %18 = arith.addf %15, %17 : vector<8x128xf32>
    %19 = arith.addf %18, %13 : vector<8x128xf32>
    %cst_17 = arith.constant 0.000000e+00 : f32
    %20 = vector.broadcast %cst_17 : f32 to vector<8x128xf32>
    %21 = arith.cmpf oge, %19, %20 : vector<8x128xf32>
    %cst_18 = arith.constant 0.00999999977 : f32
    %22 = vector.broadcast %cst_18 : f32 to vector<8x128xf32>
    %23 = arith.mulf %22, %19 : vector<8x128xf32>
    %24 = arith.select %21, %19, %23 : vector<8x128xi1>, vector<8x128xf32>
    %cst_19 = arith.constant dense<0.000000e+00> : vector<8x128xf32>
    %25 = tpu.matmul %2, %24, %cst_19 {dimension_numbers = #tpu.dot_dimension_numbers<[1], [0], [0], [1], [0, 0, 1, 1], [], []>} : vector<8x8xf32>, vector<8x128xf32>, vector<8x128xf32> -> vector<8x128xf32>
    %c0_20 = arith.constant 0 : index
    %c0_21 = arith.constant 0 : index
    %26 = vector.load %arg8[%c0_20, %c0_21] : memref<128x128xf32, #tpu.memory_space<vmem>>, vector<128x128xf32>
    %cst_22 = arith.constant dense<0.000000e+00> : vector<8x128xf32>
    %27 = tpu.matmul %25, %26, %cst_22 {dimension_numbers = #tpu.dot_dimension_numbers<[1], [0], [0], [1], [0, 0, 1, 1], [], []>} : vector<8x128xf32>, vector<128x128xf32>, vector<8x128xf32> -> vector<8x128xf32>
    %c0_23 = arith.constant 0 : index
    %c0_24 = arith.constant 0 : index
    %28 = vector.load %arg9[%c0_23, %c0_24] : memref<1x128xf32, #tpu.memory_space<vmem>>, vector<1x128xf32>
    %29 = vector.broadcast %28 : vector<1x128xf32> to vector<8x128xf32>
    %30 = arith.addf %27, %29 : vector<8x128xf32>
    %cst_25 = arith.constant 0.000000e+00 : f32
    %31 = vector.broadcast %cst_25 : f32 to vector<8x128xf32>
    %32 = arith.cmpf oge, %30, %31 : vector<8x128xf32>
    %cst_26 = arith.constant 0.00999999977 : f32
    %33 = vector.broadcast %cst_26 : f32 to vector<8x128xf32>
    %34 = arith.mulf %33, %30 : vector<8x128xf32>
    %35 = arith.select %32, %30, %34 : vector<8x128xi1>, vector<8x128xf32>
    %c0_27 = arith.constant 0 : index
    %c0_28 = arith.constant 0 : index
    %36 = vector.load %arg10[%c0_27, %c0_28] : memref<128x128xf32, #tpu.memory_space<vmem>>, vector<128x128xf32>
    %cst_29 = arith.constant dense<0.000000e+00> : vector<8x128xf32>
    %37 = tpu.matmul %35, %36, %cst_29 {dimension_numbers = #tpu.dot_dimension_numbers<[1], [0], [0], [1], [0, 0, 1, 1], [], []>} : vector<8x128xf32>, vector<128x128xf32>, vector<8x128xf32> -> vector<8x128xf32>
    %c0_30 = arith.constant 0 : index
    %c0_31 = arith.constant 0 : index
    %38 = vector.load %arg11[%c0_30, %c0_31] : memref<1x128xf32, #tpu.memory_space<vmem>>, vector<1x128xf32>
    %39 = vector.broadcast %38 : vector<1x128xf32> to vector<8x128xf32>
    %40 = arith.addf %37, %39 : vector<8x128xf32>
    %cst_32 = arith.constant 0.000000e+00 : f32
    %41 = vector.broadcast %cst_32 : f32 to vector<8x128xf32>
    %42 = arith.cmpf oge, %40, %41 : vector<8x128xf32>
    %cst_33 = arith.constant 0.00999999977 : f32
    %43 = vector.broadcast %cst_33 : f32 to vector<8x128xf32>
    %44 = arith.mulf %43, %40 : vector<8x128xf32>
    %45 = arith.select %42, %40, %44 : vector<8x128xi1>, vector<8x128xf32>
    %c0_34 = arith.constant 0 : index
    %c0_35 = arith.constant 0 : index
    %c0_36 = arith.constant 0 : index
    %46 = vector.load %arg12[%c0_34, %c0_35, %c0_36] : memref<2x128x128xf32, #tpu.memory_space<vmem>>, vector<1x128x128xf32>
    %47 = vector.shape_cast %46 : vector<1x128x128xf32> to vector<128x128xf32>
    %cst_37 = arith.constant dense<0.000000e+00> : vector<8x128xf32>
    %48 = tpu.matmul %25, %47, %cst_37 {dimension_numbers = #tpu.dot_dimension_numbers<[1], [0], [0], [1], [0, 0, 1, 1], [], []>} : vector<8x128xf32>, vector<128x128xf32>, vector<8x128xf32> -> vector<8x128xf32>
    %c0_38 = arith.constant 0 : index
    %c0_39 = arith.constant 0 : index
    %c0_40 = arith.constant 0 : index
    %49 = vector.load %arg13[%c0_38, %c0_39, %c0_40] : memref<2x128x128xf32, #tpu.memory_space<vmem>>, vector<1x128x128xf32>
    %50 = vector.shape_cast %49 : vector<1x128x128xf32> to vector<128x128xf32>
    %cst_41 = arith.constant dense<0.000000e+00> : vector<8x128xf32>
    %51 = tpu.matmul %45, %50, %cst_41 {dimension_numbers = #tpu.dot_dimension_numbers<[1], [0], [0], [1], [0, 0, 1, 1], [], []>} : vector<8x128xf32>, vector<128x128xf32>, vector<8x128xf32> -> vector<8x128xf32>
    %52 = arith.addf %48, %51 : vector<8x128xf32>
    %c0_42 = arith.constant 0 : index
    %c0_43 = arith.constant 0 : index
    %c0_44 = arith.constant 0 : index
    %53 = vector.load %arg14[%c0_42, %c0_43, %c0_44] : memref<2x1x128xf32, #tpu.memory_space<vmem>>, vector<1x1x128xf32>
    %54 = vector.shape_cast %53 : vector<1x1x128xf32> to vector<1x128xf32>
    %55 = vector.broadcast %54 : vector<1x128xf32> to vector<8x128xf32>
    %56 = arith.addf %52, %55 : vector<8x128xf32>
    %cst_45 = arith.constant 0.000000e+00 : f32
    %57 = vector.broadcast %cst_45 : f32 to vector<8x128xf32>
    %58 = arith.cmpf oge, %56, %57 : vector<8x128xf32>
    %cst_46 = arith.constant 0.00999999977 : f32
    %59 = vector.broadcast %cst_46 : f32 to vector<8x128xf32>
    %60 = arith.mulf %59, %56 : vector<8x128xf32>
    %61 = arith.select %58, %56, %60 : vector<8x128xi1>, vector<8x128xf32>
    %c0_47 = arith.constant 0 : index
    %c0_48 = arith.constant 0 : index
    %c0_49 = arith.constant 0 : index
    %62 = vector.load %arg15[%c0_47, %c0_48, %c0_49] : memref<2x128x128xf32, #tpu.memory_space<vmem>>, vector<1x128x128xf32>
    %63 = vector.shape_cast %62 : vector<1x128x128xf32> to vector<128x128xf32>
    %cst_50 = arith.constant dense<0.000000e+00> : vector<8x128xf32>
    %64 = tpu.matmul %61, %63, %cst_50 {dimension_numbers = #tpu.dot_dimension_numbers<[1], [0], [0], [1], [0, 0, 1, 1], [], []>} : vector<8x128xf32>, vector<128x128xf32>, vector<8x128xf32> -> vector<8x128xf32>
    %c0_51 = arith.constant 0 : index
    %c0_52 = arith.constant 0 : index
    %c0_53 = arith.constant 0 : index
    %65 = vector.load %arg16[%c0_51, %c0_52, %c0_53] : memref<2x1x128xf32, #tpu.memory_space<vmem>>, vector<1x1x128xf32>
    %66 = vector.shape_cast %65 : vector<1x1x128xf32> to vector<1x128xf32>
    %67 = vector.broadcast %66 : vector<1x128xf32> to vector<8x128xf32>
    %68 = arith.addf %64, %67 : vector<8x128xf32>
    %69 = arith.addf %68, %45 : vector<8x128xf32>
    %cst_54 = arith.constant 0.000000e+00 : f32
    %70 = vector.broadcast %cst_54 : f32 to vector<8x128xf32>
    %71 = arith.cmpf oge, %69, %70 : vector<8x128xf32>
    %cst_55 = arith.constant 0.00999999977 : f32
    %72 = vector.broadcast %cst_55 : f32 to vector<8x128xf32>
    %73 = arith.mulf %72, %69 : vector<8x128xf32>
    %74 = arith.select %71, %69, %73 : vector<8x128xi1>, vector<8x128xf32>
    %c0_56 = arith.constant 0 : index
    %c0_57 = arith.constant 0 : index
    %c0_58 = arith.constant 0 : index
    %75 = vector.load %arg18[%c0_56, %c0_57, %c0_58] : memref<2x128x128xf32, #tpu.memory_space<vmem>>, vector<1x128x128xf32>
    %76 = vector.shape_cast %75 : vector<1x128x128xf32> to vector<128x128xf32>
    %cst_59 = arith.constant dense<0.000000e+00> : vector<8x128xf32>
    %77 = tpu.matmul %74, %76, %cst_59 {dimension_numbers = #tpu.dot_dimension_numbers<[1], [0], [0], [1], [0, 0, 1, 1], [], []>} : vector<8x128xf32>, vector<128x128xf32>, vector<8x128xf32> -> vector<8x128xf32>
    %c0_60 = arith.constant 0 : index
    %c0_61 = arith.constant 0 : index
    %c0_62 = arith.constant 0 : index
    %78 = vector.load %arg19[%c0_60, %c0_61, %c0_62] : memref<2x1x128xf32, #tpu.memory_space<vmem>>, vector<1x1x128xf32>
    %79 = vector.shape_cast %78 : vector<1x1x128xf32> to vector<1x128xf32>
    %80 = vector.broadcast %79 : vector<1x128xf32> to vector<8x128xf32>
    %81 = arith.addf %77, %80 : vector<8x128xf32>
    %cst_63 = arith.constant dense<0.000000e+00> : vector<8x128xf32>
    %82 = tpu.matmul %3, %81, %cst_63 {dimension_numbers = #tpu.dot_dimension_numbers<[1], [0], [0], [1], [0, 0, 1, 1], [], []>} : vector<8x8xf32>, vector<8x128xf32>, vector<8x128xf32> -> vector<8x128xf32>
    %c0_64 = arith.constant 0 : index
    %c0_65 = arith.constant 0 : index
    %c0_66 = arith.constant 0 : index
    %83 = vector.load %arg17[%c0_64, %c0_65, %c0_66] : memref<2x128x128xf32, #tpu.memory_space<vmem>>, vector<1x128x128xf32>
    %84 = vector.shape_cast %83 : vector<1x128x128xf32> to vector<128x128xf32>
    %cst_67 = arith.constant dense<0.000000e+00> : vector<8x128xf32>
    %85 = tpu.matmul %24, %84, %cst_67 {dimension_numbers = #tpu.dot_dimension_numbers<[1], [0], [0], [1], [0, 0, 1, 1], [], []>} : vector<8x128xf32>, vector<128x128xf32>, vector<8x128xf32> -> vector<8x128xf32>
    %86 = arith.addf %85, %82 : vector<8x128xf32>
    %cst_68 = arith.constant 0.000000e+00 : f32
    %87 = vector.broadcast %cst_68 : f32 to vector<8x128xf32>
    %88 = arith.cmpf oge, %86, %87 : vector<8x128xf32>
    %cst_69 = arith.constant 0.00999999977 : f32
    %89 = vector.broadcast %cst_69 : f32 to vector<8x128xf32>
    %90 = arith.mulf %89, %86 : vector<8x128xf32>
    %91 = arith.select %88, %86, %90 : vector<8x128xi1>, vector<8x128xf32>
    %c0_70 = arith.constant 0 : index
    %c0_71 = arith.constant 0 : index
    %c0_72 = arith.constant 0 : index
    %92 = vector.load %arg20[%c0_70, %c0_71, %c0_72] : memref<2x128x128xf32, #tpu.memory_space<vmem>>, vector<1x128x128xf32>
    %93 = vector.shape_cast %92 : vector<1x128x128xf32> to vector<128x128xf32>
    %cst_73 = arith.constant dense<0.000000e+00> : vector<8x128xf32>
    %94 = tpu.matmul %91, %93, %cst_73 {dimension_numbers = #tpu.dot_dimension_numbers<[1], [0], [0], [1], [0, 0, 1, 1], [], []>} : vector<8x128xf32>, vector<128x128xf32>, vector<8x128xf32> -> vector<8x128xf32>
    %c0_74 = arith.constant 0 : index
    %c0_75 = arith.constant 0 : index
    %c0_76 = arith.constant 0 : index
    %95 = vector.load %arg21[%c0_74, %c0_75, %c0_76] : memref<2x1x128xf32, #tpu.memory_space<vmem>>, vector<1x1x128xf32>
    %96 = vector.shape_cast %95 : vector<1x1x128xf32> to vector<1x128xf32>
    %97 = vector.broadcast %96 : vector<1x128xf32> to vector<8x128xf32>
    %98 = arith.addf %94, %97 : vector<8x128xf32>
    %99 = arith.addf %98, %24 : vector<8x128xf32>
    %cst_77 = arith.constant 0.000000e+00 : f32
    %100 = vector.broadcast %cst_77 : f32 to vector<8x128xf32>
    %101 = arith.cmpf oge, %99, %100 : vector<8x128xf32>
    %cst_78 = arith.constant 0.00999999977 : f32
    %102 = vector.broadcast %cst_78 : f32 to vector<8x128xf32>
    %103 = arith.mulf %102, %99 : vector<8x128xf32>
    %104 = arith.select %101, %99, %103 : vector<8x128xi1>, vector<8x128xf32>
    %cst_79 = arith.constant dense<0.000000e+00> : vector<8x128xf32>
    %105 = tpu.matmul %2, %104, %cst_79 {dimension_numbers = #tpu.dot_dimension_numbers<[1], [0], [0], [1], [0, 0, 1, 1], [], []>} : vector<8x8xf32>, vector<8x128xf32>, vector<8x128xf32> -> vector<8x128xf32>
    %c1 = arith.constant 1 : index
    %c0_80 = arith.constant 0 : index
    %c0_81 = arith.constant 0 : index
    %106 = vector.load %arg12[%c1, %c0_80, %c0_81] : memref<2x128x128xf32, #tpu.memory_space<vmem>>, vector<1x128x128xf32>
    %107 = vector.shape_cast %106 : vector<1x128x128xf32> to vector<128x128xf32>
    %cst_82 = arith.constant dense<0.000000e+00> : vector<8x128xf32>
    %108 = tpu.matmul %105, %107, %cst_82 {dimension_numbers = #tpu.dot_dimension_numbers<[1], [0], [0], [1], [0, 0, 1, 1], [], []>} : vector<8x128xf32>, vector<128x128xf32>, vector<8x128xf32> -> vector<8x128xf32>
    %c1_83 = arith.constant 1 : index
    %c0_84 = arith.constant 0 : index
    %c0_85 = arith.constant 0 : index
    %109 = vector.load %arg13[%c1_83, %c0_84, %c0_85] : memref<2x128x128xf32, #tpu.memory_space<vmem>>, vector<1x128x128xf32>
    %110 = vector.shape_cast %109 : vector<1x128x128xf32> to vector<128x128xf32>
    %cst_86 = arith.constant dense<0.000000e+00> : vector<8x128xf32>
    %111 = tpu.matmul %74, %110, %cst_86 {dimension_numbers = #tpu.dot_dimension_numbers<[1], [0], [0], [1], [0, 0, 1, 1], [], []>} : vector<8x128xf32>, vector<128x128xf32>, vector<8x128xf32> -> vector<8x128xf32>
    %112 = arith.addf %108, %111 : vector<8x128xf32>
    %c1_87 = arith.constant 1 : index
    %c0_88 = arith.constant 0 : index
    %c0_89 = arith.constant 0 : index
    %113 = vector.load %arg14[%c1_87, %c0_88, %c0_89] : memref<2x1x128xf32, #tpu.memory_space<vmem>>, vector<1x1x128xf32>
    %114 = vector.shape_cast %113 : vector<1x1x128xf32> to vector<1x128xf32>
    %115 = vector.broadcast %114 : vector<1x128xf32> to vector<8x128xf32>
    %116 = arith.addf %112, %115 : vector<8x128xf32>
    %cst_90 = arith.constant 0.000000e+00 : f32
    %117 = vector.broadcast %cst_90 : f32 to vector<8x128xf32>
    %118 = arith.cmpf oge, %116, %117 : vector<8x128xf32>
    %cst_91 = arith.constant 0.00999999977 : f32
    %119 = vector.broadcast %cst_91 : f32 to vector<8x128xf32>
    %120 = arith.mulf %119, %116 : vector<8x128xf32>
    %121 = arith.select %118, %116, %120 : vector<8x128xi1>, vector<8x128xf32>
    %c1_92 = arith.constant 1 : index
    %c0_93 = arith.constant 0 : index
    %c0_94 = arith.constant 0 : index
    %122 = vector.load %arg15[%c1_92, %c0_93, %c0_94] : memref<2x128x128xf32, #tpu.memory_space<vmem>>, vector<1x128x128xf32>
    %123 = vector.shape_cast %122 : vector<1x128x128xf32> to vector<128x128xf32>
    %cst_95 = arith.constant dense<0.000000e+00> : vector<8x128xf32>
    %124 = tpu.matmul %121, %123, %cst_95 {dimension_numbers = #tpu.dot_dimension_numbers<[1], [0], [0], [1], [0, 0, 1, 1], [], []>} : vector<8x128xf32>, vector<128x128xf32>, vector<8x128xf32> -> vector<8x128xf32>
    %c1_96 = arith.constant 1 : index
    %c0_97 = arith.constant 0 : index
    %c0_98 = arith.constant 0 : index
    %125 = vector.load %arg16[%c1_96, %c0_97, %c0_98] : memref<2x1x128xf32, #tpu.memory_space<vmem>>, vector<1x1x128xf32>
    %126 = vector.shape_cast %125 : vector<1x1x128xf32> to vector<1x128xf32>
    %127 = vector.broadcast %126 : vector<1x128xf32> to vector<8x128xf32>
    %128 = arith.addf %124, %127 : vector<8x128xf32>
    %129 = arith.addf %128, %74 : vector<8x128xf32>
    %cst_99 = arith.constant 0.000000e+00 : f32
    %130 = vector.broadcast %cst_99 : f32 to vector<8x128xf32>
    %131 = arith.cmpf oge, %129, %130 : vector<8x128xf32>
    %cst_100 = arith.constant 0.00999999977 : f32
    %132 = vector.broadcast %cst_100 : f32 to vector<8x128xf32>
    %133 = arith.mulf %132, %129 : vector<8x128xf32>
    %134 = arith.select %131, %129, %133 : vector<8x128xi1>, vector<8x128xf32>
    %c1_101 = arith.constant 1 : index
    %c0_102 = arith.constant 0 : index
    %c0_103 = arith.constant 0 : index
    %135 = vector.load %arg18[%c1_101, %c0_102, %c0_103] : memref<2x128x128xf32, #tpu.memory_space<vmem>>, vector<1x128x128xf32>
    %136 = vector.shape_cast %135 : vector<1x128x128xf32> to vector<128x128xf32>
    %cst_104 = arith.constant dense<0.000000e+00> : vector<8x128xf32>
    %137 = tpu.matmul %134, %136, %cst_104 {dimension_numbers = #tpu.dot_dimension_numbers<[1], [0], [0], [1], [0, 0, 1, 1], [], []>} : vector<8x128xf32>, vector<128x128xf32>, vector<8x128xf32> -> vector<8x128xf32>
    %c1_105 = arith.constant 1 : index
    %c0_106 = arith.constant 0 : index
    %c0_107 = arith.constant 0 : index
    %138 = vector.load %arg19[%c1_105, %c0_106, %c0_107] : memref<2x1x128xf32, #tpu.memory_space<vmem>>, vector<1x1x128xf32>
    %139 = vector.shape_cast %138 : vector<1x1x128xf32> to vector<1x128xf32>
    %140 = vector.broadcast %139 : vector<1x128xf32> to vector<8x128xf32>
    %141 = arith.addf %137, %140 : vector<8x128xf32>
    %cst_108 = arith.constant dense<0.000000e+00> : vector<8x128xf32>
    %142 = tpu.matmul %3, %141, %cst_108 {dimension_numbers = #tpu.dot_dimension_numbers<[1], [0], [0], [1], [0, 0, 1, 1], [], []>} : vector<8x8xf32>, vector<8x128xf32>, vector<8x128xf32> -> vector<8x128xf32>
    %c1_109 = arith.constant 1 : index
    %c0_110 = arith.constant 0 : index
    %c0_111 = arith.constant 0 : index
    %143 = vector.load %arg17[%c1_109, %c0_110, %c0_111] : memref<2x128x128xf32, #tpu.memory_space<vmem>>, vector<1x128x128xf32>
    %144 = vector.shape_cast %143 : vector<1x128x128xf32> to vector<128x128xf32>
    %cst_112 = arith.constant dense<0.000000e+00> : vector<8x128xf32>
    %145 = tpu.matmul %104, %144, %cst_112 {dimension_numbers = #tpu.dot_dimension_numbers<[1], [0], [0], [1], [0, 0, 1, 1], [], []>} : vector<8x128xf32>, vector<128x128xf32>, vector<8x128xf32> -> vector<8x128xf32>
    %146 = arith.addf %145, %142 : vector<8x128xf32>
    %cst_113 = arith.constant 0.000000e+00 : f32
    %147 = vector.broadcast %cst_113 : f32 to vector<8x128xf32>
    %148 = arith.cmpf oge, %146, %147 : vector<8x128xf32>
    %cst_114 = arith.constant 0.00999999977 : f32
    %149 = vector.broadcast %cst_114 : f32 to vector<8x128xf32>
    %150 = arith.mulf %149, %146 : vector<8x128xf32>
    %151 = arith.select %148, %146, %150 : vector<8x128xi1>, vector<8x128xf32>
    %c1_115 = arith.constant 1 : index
    %c0_116 = arith.constant 0 : index
    %c0_117 = arith.constant 0 : index
    %152 = vector.load %arg20[%c1_115, %c0_116, %c0_117] : memref<2x128x128xf32, #tpu.memory_space<vmem>>, vector<1x128x128xf32>
    %153 = vector.shape_cast %152 : vector<1x128x128xf32> to vector<128x128xf32>
    %cst_118 = arith.constant dense<0.000000e+00> : vector<8x128xf32>
    %154 = tpu.matmul %151, %153, %cst_118 {dimension_numbers = #tpu.dot_dimension_numbers<[1], [0], [0], [1], [0, 0, 1, 1], [], []>} : vector<8x128xf32>, vector<128x128xf32>, vector<8x128xf32> -> vector<8x128xf32>
    %c1_119 = arith.constant 1 : index
    %c0_120 = arith.constant 0 : index
    %c0_121 = arith.constant 0 : index
    %155 = vector.load %arg21[%c1_119, %c0_120, %c0_121] : memref<2x1x128xf32, #tpu.memory_space<vmem>>, vector<1x1x128xf32>
    %156 = vector.shape_cast %155 : vector<1x1x128xf32> to vector<1x128xf32>
    %157 = vector.broadcast %156 : vector<1x128xf32> to vector<8x128xf32>
    %158 = arith.addf %154, %157 : vector<8x128xf32>
    %159 = arith.addf %158, %104 : vector<8x128xf32>
    %cst_122 = arith.constant 0.000000e+00 : f32
    %160 = vector.broadcast %cst_122 : f32 to vector<8x128xf32>
    %161 = arith.cmpf oge, %159, %160 : vector<8x128xf32>
    %cst_123 = arith.constant 0.00999999977 : f32
    %162 = vector.broadcast %cst_123 : f32 to vector<8x128xf32>
    %163 = arith.mulf %162, %159 : vector<8x128xf32>
    %164 = arith.select %161, %159, %163 : vector<8x128xi1>, vector<8x128xf32>
    %cst_124 = arith.constant dense<0.000000e+00> : vector<8x128xf32>
    %165 = tpu.matmul %2, %164, %cst_124 {dimension_numbers = #tpu.dot_dimension_numbers<[1], [0], [0], [1], [0, 0, 1, 1], [], []>} : vector<8x8xf32>, vector<8x128xf32>, vector<8x128xf32> -> vector<8x128xf32>
    %c0_125 = arith.constant 0 : index
    %c0_126 = arith.constant 0 : index
    %166 = vector.load %arg22[%c0_125, %c0_126] : memref<128x128xf32, #tpu.memory_space<vmem>>, vector<128x128xf32>
    %cst_127 = arith.constant dense<0.000000e+00> : vector<8x128xf32>
    %167 = tpu.matmul %165, %166, %cst_127 {dimension_numbers = #tpu.dot_dimension_numbers<[1], [0], [0], [1], [0, 0, 1, 1], [], []>} : vector<8x128xf32>, vector<128x128xf32>, vector<8x128xf32> -> vector<8x128xf32>
    %c0_128 = arith.constant 0 : index
    %c0_129 = arith.constant 0 : index
    %168 = vector.load %arg23[%c0_128, %c0_129] : memref<128x128xf32, #tpu.memory_space<vmem>>, vector<128x128xf32>
    %cst_130 = arith.constant dense<0.000000e+00> : vector<8x128xf32>
    %169 = tpu.matmul %134, %168, %cst_130 {dimension_numbers = #tpu.dot_dimension_numbers<[1], [0], [0], [1], [0, 0, 1, 1], [], []>} : vector<8x128xf32>, vector<128x128xf32>, vector<8x128xf32> -> vector<8x128xf32>
    %170 = arith.addf %167, %169 : vector<8x128xf32>
    %c0_131 = arith.constant 0 : index
    %c0_132 = arith.constant 0 : index
    %171 = vector.load %arg24[%c0_131, %c0_132] : memref<1x128xf32, #tpu.memory_space<vmem>>, vector<1x128xf32>
    %172 = vector.broadcast %171 : vector<1x128xf32> to vector<8x128xf32>
    %173 = arith.addf %170, %172 : vector<8x128xf32>
    %cst_133 = arith.constant 0.000000e+00 : f32
    %174 = vector.broadcast %cst_133 : f32 to vector<8x128xf32>
    %175 = arith.cmpf oge, %173, %174 : vector<8x128xf32>
    %cst_134 = arith.constant 0.00999999977 : f32
    %176 = vector.broadcast %cst_134 : f32 to vector<8x128xf32>
    %177 = arith.mulf %176, %173 : vector<8x128xf32>
    %178 = arith.select %175, %173, %177 : vector<8x128xi1>, vector<8x128xf32>
    %c0_135 = arith.constant 0 : index
    %c0_136 = arith.constant 0 : index
    %179 = vector.load %arg25[%c0_135, %c0_136] : memref<128x128xf32, #tpu.memory_space<vmem>>, vector<128x128xf32>
    %cst_137 = arith.constant dense<0.000000e+00> : vector<8x128xf32>
    %180 = tpu.matmul %178, %179, %cst_137 {dimension_numbers = #tpu.dot_dimension_numbers<[1], [0], [0], [1], [0, 0, 1, 1], [], []>} : vector<8x128xf32>, vector<128x128xf32>, vector<8x128xf32> -> vector<8x128xf32>
    %c0_138 = arith.constant 0 : index
    %c0_139 = arith.constant 0 : index
    %181 = vector.load %arg26[%c0_138, %c0_139] : memref<1x128xf32, #tpu.memory_space<vmem>>, vector<1x128xf32>
    %182 = vector.broadcast %181 : vector<1x128xf32> to vector<8x128xf32>
    %183 = arith.addf %180, %182 : vector<8x128xf32>
    %184 = arith.addf %183, %178 : vector<8x128xf32>
    %cst_140 = arith.constant 0.000000e+00 : f32
    %185 = vector.broadcast %cst_140 : f32 to vector<8x128xf32>
    %186 = arith.cmpf oge, %184, %185 : vector<8x128xf32>
    %cst_141 = arith.constant 0.00999999977 : f32
    %187 = vector.broadcast %cst_141 : f32 to vector<8x128xf32>
    %188 = arith.mulf %187, %184 : vector<8x128xf32>
    %189 = arith.select %186, %184, %188 : vector<8x128xi1>, vector<8x128xf32>
    %c0_142 = arith.constant 0 : index
    %c0_143 = arith.constant 0 : index
    %190 = vector.load %arg27[%c0_142, %c0_143] : memref<128x128xf32, #tpu.memory_space<vmem>>, vector<128x128xf32>
    %cst_144 = arith.constant dense<0.000000e+00> : vector<8x128xf32>
    %191 = tpu.matmul %189, %190, %cst_144 {dimension_numbers = #tpu.dot_dimension_numbers<[1], [0], [0], [1], [0, 0, 1, 1], [], []>} : vector<8x128xf32>, vector<128x128xf32>, vector<8x128xf32> -> vector<8x128xf32>
    %c0_145 = arith.constant 0 : index
    %c0_146 = arith.constant 0 : index
    %192 = vector.load %arg28[%c0_145, %c0_146] : memref<1x128xf32, #tpu.memory_space<vmem>>, vector<1x128xf32>
    %193 = vector.broadcast %192 : vector<1x128xf32> to vector<8x128xf32>
    %194 = arith.addf %191, %193 : vector<8x128xf32>
    %c0_147 = arith.constant 0 : index
    %c0_148 = arith.constant 0 : index
    %c0_149 = arith.constant 0 : index
    %195 = vector.load %arg29[%c0_147, %c0_148, %c0_149] : memref<1x8x128xf32, #tpu.memory_space<vmem>>, vector<1x8x128xf32>
    %196 = vector.shape_cast %195 : vector<1x8x128xf32> to vector<8x128xf32>
    %197 = vector.shape_cast %194 : vector<8x128xf32> to vector<1x8x128xf32>
    tpu.vector_store %arg29[%c0_147, %c0_148, %c0_149], %197 {strides = array<i32>} : memref<1x8x128xf32, #tpu.memory_space<vmem>>, vector<1x8x128xf32>,
    return
  }
  func.func @transform_0(%arg0: i32) -> (i32, i32) {
    %c0_i32 = arith.constant 0 : i32
    %c0_i32_0 = arith.constant 0 : i32
    return %arg0, %c0_i32 : i32, i32
  }
  func.func @transform_1(%arg0: i32) -> (i32, i32, i32) {
    %c0_i32 = arith.constant 0 : i32
    %c0_i32_0 = arith.constant 0 : i32
    %c0_i32_1 = arith.constant 0 : i32
    return %arg0, %c0_i32, %c0_i32_0 : i32, i32, i32
  }
  func.func @transform_2(%arg0: i32) -> (i32, i32) {
    %c0_i32 = arith.constant 0 : i32
    %c0_i32_0 = arith.constant 0 : i32
    %c0_i32_1 = arith.constant 0 : i32
    return %c0_i32, %c0_i32_0 : i32, i32
  }
  func.func @transform_3(%arg0: i32) -> (i32, i32) {
    %c0_i32 = arith.constant 0 : i32
    %c0_i32_0 = arith.constant 0 : i32
    %c0_i32_1 = arith.constant 0 : i32
    return %c0_i32, %c0_i32_0 : i32, i32
  }
  func.func @transform_4(%arg0: i32) -> (i32, i32) {
    %c0_i32 = arith.constant 0 : i32
    %c0_i32_0 = arith.constant 0 : i32
    %c0_i32_1 = arith.constant 0 : i32
    return %c0_i32, %c0_i32_0 : i32, i32
  }
  func.func @transform_5(%arg0: i32) -> (i32, i32) {
    %c0_i32 = arith.constant 0 : i32
    %c0_i32_0 = arith.constant 0 : i32
    %c0_i32_1 = arith.constant 0 : i32
    return %c0_i32, %c0_i32_0 : i32, i32
  }
  func.func @transform_6(%arg0: i32) -> (i32, i32) {
    %c0_i32 = arith.constant 0 : i32
    %c0_i32_0 = arith.constant 0 : i32
    %c0_i32_1 = arith.constant 0 : i32
    return %c0_i32, %c0_i32_0 : i32, i32
  }
  func.func @transform_7(%arg0: i32) -> (i32, i32) {
    %c0_i32 = arith.constant 0 : i32
    %c0_i32_0 = arith.constant 0 : i32
    %c0_i32_1 = arith.constant 0 : i32
    return %c0_i32, %c0_i32_0 : i32, i32
  }
  func.func @transform_8(%arg0: i32) -> (i32, i32) {
    %c0_i32 = arith.constant 0 : i32
    %c0_i32_0 = arith.constant 0 : i32
    %c0_i32_1 = arith.constant 0 : i32
    return %c0_i32, %c0_i32_0 : i32, i32
  }
  func.func @transform_9(%arg0: i32) -> (i32, i32) {
    %c0_i32 = arith.constant 0 : i32
    %c0_i32_0 = arith.constant 0 : i32
    %c0_i32_1 = arith.constant 0 : i32
    return %c0_i32, %c0_i32_0 : i32, i32
  }
  func.func @transform_10(%arg0: i32) -> (i32, i32) {
    %c0_i32 = arith.constant 0 : i32
    %c0_i32_0 = arith.constant 0 : i32
    %c0_i32_1 = arith.constant 0 : i32
    return %c0_i32, %c0_i32_0 : i32, i32
  }
  func.func @transform_11(%arg0: i32) -> (i32, i32, i32) {
    %c0_i32 = arith.constant 0 : i32
    %c0_i32_0 = arith.constant 0 : i32
    %c0_i32_1 = arith.constant 0 : i32
    %c0_i32_2 = arith.constant 0 : i32
    return %c0_i32, %c0_i32_0, %c0_i32_1 : i32, i32, i32
  }
  func.func @transform_12(%arg0: i32) -> (i32, i32, i32) {
    %c0_i32 = arith.constant 0 : i32
    %c0_i32_0 = arith.constant 0 : i32
    %c0_i32_1 = arith.constant 0 : i32
    %c0_i32_2 = arith.constant 0 : i32
    return %c0_i32, %c0_i32_0, %c0_i32_1 : i32, i32, i32
  }
  func.func @transform_13(%arg0: i32) -> (i32, i32, i32) {
    %c0_i32 = arith.constant 0 : i32
    %c0_i32_0 = arith.constant 0 : i32
    %c0_i32_1 = arith.constant 0 : i32
    %c0_i32_2 = arith.constant 0 : i32
    return %c0_i32, %c0_i32_0, %c0_i32_1 : i32, i32, i32
  }
  func.func @transform_14(%arg0: i32) -> (i32, i32, i32) {
    %c0_i32 = arith.constant 0 : i32
    %c0_i32_0 = arith.constant 0 : i32
    %c0_i32_1 = arith.constant 0 : i32
    %c0_i32_2 = arith.constant 0 : i32
    return %c0_i32, %c0_i32_0, %c0_i32_1 : i32, i32, i32
  }
  func.func @transform_15(%arg0: i32) -> (i32, i32, i32) {
    %c0_i32 = arith.constant 0 : i32
    %c0_i32_0 = arith.constant 0 : i32
    %c0_i32_1 = arith.constant 0 : i32
    %c0_i32_2 = arith.constant 0 : i32
    return %c0_i32, %c0_i32_0, %c0_i32_1 : i32, i32, i32
  }
  func.func @transform_16(%arg0: i32) -> (i32, i32, i32) {
    %c0_i32 = arith.constant 0 : i32
    %c0_i32_0 = arith.constant 0 : i32
    %c0_i32_1 = arith.constant 0 : i32
    %c0_i32_2 = arith.constant 0 : i32
    return %c0_i32, %c0_i32_0, %c0_i32_1 : i32, i32, i32
  }
  func.func @transform_17(%arg0: i32) -> (i32, i32, i32) {
    %c0_i32 = arith.constant 0 : i32
    %c0_i32_0 = arith.constant 0 : i32
    %c0_i32_1 = arith.constant 0 : i32
    %c0_i32_2 = arith.constant 0 : i32
    return %c0_i32, %c0_i32_0, %c0_i32_1 : i32, i32, i32
  }
  func.func @transform_18(%arg0: i32) -> (i32, i32, i32) {
    %c0_i32 = arith.constant 0 : i32
    %c0_i32_0 = arith.constant 0 : i32
    %c0_i32_1 = arith.constant 0 : i32
    %c0_i32_2 = arith.constant 0 : i32
    return %c0_i32, %c0_i32_0, %c0_i32_1 : i32, i32, i32
  }
  func.func @transform_19(%arg0: i32) -> (i32, i32, i32) {
    %c0_i32 = arith.constant 0 : i32
    %c0_i32_0 = arith.constant 0 : i32
    %c0_i32_1 = arith.constant 0 : i32
    %c0_i32_2 = arith.constant 0 : i32
    return %c0_i32, %c0_i32_0, %c0_i32_1 : i32, i32, i32
  }
  func.func @transform_20(%arg0: i32) -> (i32, i32, i32) {
    %c0_i32 = arith.constant 0 : i32
    %c0_i32_0 = arith.constant 0 : i32
    %c0_i32_1 = arith.constant 0 : i32
    %c0_i32_2 = arith.constant 0 : i32
    return %c0_i32, %c0_i32_0, %c0_i32_1 : i32, i32, i32
  }
  func.func @transform_21(%arg0: i32) -> (i32, i32) {
    %c0_i32 = arith.constant 0 : i32
    %c0_i32_0 = arith.constant 0 : i32
    %c0_i32_1 = arith.constant 0 : i32
    return %c0_i32, %c0_i32_0 : i32, i32
  }
  func.func @transform_22(%arg0: i32) -> (i32, i32) {
    %c0_i32 = arith.constant 0 : i32
    %c0_i32_0 = arith.constant 0 : i32
    %c0_i32_1 = arith.constant 0 : i32
    return %c0_i32, %c0_i32_0 : i32, i32
  }
  func.func @transform_23(%arg0: i32) -> (i32, i32) {
    %c0_i32 = arith.constant 0 : i32
    %c0_i32_0 = arith.constant 0 : i32
    %c0_i32_1 = arith.constant 0 : i32
    return %c0_i32, %c0_i32_0 : i32, i32
  }
  func.func @transform_24(%arg0: i32) -> (i32, i32) {
    %c0_i32 = arith.constant 0 : i32
    %c0_i32_0 = arith.constant 0 : i32
    %c0_i32_1 = arith.constant 0 : i32
    return %c0_i32, %c0_i32_0 : i32, i32
  }
  func.func @transform_25(%arg0: i32) -> (i32, i32) {
    %c0_i32 = arith.constant 0 : i32
    %c0_i32_0 = arith.constant 0 : i32
    %c0_i32_1 = arith.constant 0 : i32
    return %c0_i32, %c0_i32_0 : i32, i32
  }
  func.func @transform_26(%arg0: i32) -> (i32, i32) {
    %c0_i32 = arith.constant 0 : i32
    %c0_i32_0 = arith.constant 0 : i32
    %c0_i32_1 = arith.constant 0 : i32
    return %c0_i32, %c0_i32_0 : i32, i32
  }
  func.func @transform_27(%arg0: i32) -> (i32, i32) {
    %c0_i32 = arith.constant 0 : i32
    %c0_i32_0 = arith.constant 0 : i32
    %c0_i32_1 = arith.constant 0 : i32
    return %c0_i32, %c0_i32_0 : i32, i32
  }
  func.func @transform_28(%arg0: i32) -> (i32, i32, i32) {
    %c0_i32 = arith.constant 0 : i32
    %c0_i32_0 = arith.constant 0 : i32
    %c0_i32_1 = arith.constant 0 : i32
    return %arg0, %c0_i32, %c0_i32_0 : i32, i32, i32
  }
}

</mosaic_0001>

<bundles_post_ra>
// kernel: epic_discriminator_forward.1
= control target key start
LH: loop header
LB: loop body
LE: loop exit
PB: predicated region body
PF: predicated region fallthrough
CT: control target
= control target key end

     0   :  { %s3181_s0 = inlined_call_operand.vmem [shape: f32[16,8], index: 0, kind: input, shape index: {}]   ;;  %s3182_s1 = inlined_call_operand.vmem [shape: f32[2,8,8], index: 1, kind: input, shape index: {}]   ;;  %s3183_s2 = inlined_call_operand.vmem [shape: f32[8,8], index: 2, kind: input, shape index: {}]   ;;  %s3184_s3 = inlined_call_operand.vmem [shape: f32[8,128], index: 3, kind: input, shape index: {}]   ;;  %s3185_s4 = inlined_call_operand.vmem [shape: f32[1,128], index: 4, kind: input, shape index: {}]   ;;  %s3186_s5 = inlined_call_operand.vmem [shape: f32[128,128], index: 5, kind: input, shape index: {}]   ;;  %s3187_s6 = inlined_call_operand.vmem [shape: f32[1,128], index: 6, kind: input, shape index: {}]   ;;  %s3188_s7 = inlined_call_operand.vmem [shape: f32[128,128], index: 7, kind: input, shape index: {}]   ;;  %s3189_s8 = inlined_call_operand.vmem [shape: f32[1,128], index: 8, kind: input, shape index: {}]   ;;  %s3190_s9 = inlined_call_operand.vmem [shape: f32[128,128], index: 9, kind: input, shape index: {}]   ;;  %s3191_s10 = inlined_call_operand.vmem [shape: f32[1,128], index: 10, kind: input, shape index: {}]   ;;  %s3192_s11 = inlined_call_operand.vmem [shape: f32[2,128,128], index: 11, kind: input, shape index: {}]   ;;  %s3193_s12 = inlined_call_operand.vmem [shape: f32[2,128,128], index: 12, kind: input, shape index: {}]   ;;  %s3194_s13 = inlined_call_operand.vmem [shape: f32[2,1,128], index: 13, kind: input, shape index: {}]   ;;  %s3195_s14 = inlined_call_operand.vmem [shape: f32[2,128,128], index: 14, kind: input, shape index: {}]   ;;  %s3196_s15 = inlined_call_operand.vmem [shape: f32[2,1,128], index: 15, kind: input, shape index: {}]   ;;  %s3197_s16 = inlined_call_operand.vmem [shape: f32[2,128,128], index: 16, kind: input, shape index: {}]   ;;  %s3198_s17 = inlined_call_operand.vmem [shape: f32[2,128,128], index: 17, kind: input, shape index: {}]   ;;  %s3199_s18 = inlined_call_operand.vmem [shape: f32[2,1,128], index: 18, kind: input, shape index: {}]   ;;  %s3200_s19 = inlined_call_operand.vmem [shape: f32[2,128,128], index: 19, kind: input, shape index: {}]   ;;  %s3201_s20 = inlined_call_operand.vmem [shape: f32[2,1,128], index: 20, kind: input, shape index: {}]   ;;  %s3202_s21 = inlined_call_operand.vmem [shape: f32[128,128], index: 21, kind: input, shape index: {}]   ;;  %s3203_s22 = inlined_call_operand.vmem [shape: f32[128,128], index: 22, kind: input, shape index: {}]   ;;  %s3204_s23 = inlined_call_operand.vmem [shape: f32[1,128], index: 23, kind: input, shape index: {}]   ;;  %s3205_s24 = inlined_call_operand.vmem [shape: f32[128,128], index: 24, kind: input, shape index: {}]   ;;  %s3206_s25 = inlined_call_operand.vmem [shape: f32[1,128], index: 25, kind: input, shape index: {}]   ;;  %s3207_s26 = inlined_call_operand.vmem [shape: f32[128,128], index: 26, kind: input, shape index: {}]   ;;  %s3208_s27 = inlined_call_operand.vmem [shape: f32[1,128], index: 27, kind: input, shape index: {}]   ;;  %s3209_s28 = inlined_call_operand.vmem [shape: f32[2,8,128], index: 28, kind: output, shape index: {}]  }
   0x1   :  { %3218 = sst [smem:[#allocation3_spill]] %s3181_s0 }
   0x2   :  { %3219 = sst [smem:[#allocation4_spill]] %s3182_s1 }
   0x3   :  { %3220 = sst [smem:[#allocation5_spill]] %s3183_s2 }
   0x4   :  { %3221 = sst [smem:[#allocation6_spill]] %s3184_s3 }
   0x5   :  { %3222 = sst [smem:[#allocation7_spill]] %s3185_s4 }
   0x6   :  { %3223 = sst [smem:[#allocation8_spill]] %s3186_s5 }
   0x7   :  { %3224 = sst [smem:[#allocation9_spill]] %s3187_s6 }
   0x8   :  { %3225 = sst [smem:[#allocation10_spill]] %s3188_s7 }
   0x9   :  { %3226 = sst [smem:[#allocation11_spill]] %s3189_s8  ;;  %s2155_s8 = smov 0  }
   0xa   :  { %3227 = sst [smem:[#allocation12_spill]] %s3190_s9 }
   0xb   :  { %3228 = sst [smem:[#allocation13_spill]] %s3191_s10 }
   0xc   :  { %3229 = sst [smem:[#allocation14_spill]] %s3192_s11 }
   0xd   :  { %3230 = sst [smem:[#allocation15_spill]] %s3193_s12 }
   0xe LB: > { %3231 = sst [smem:[#allocation2_spill]] %s2008_s8  ;;  %s1863_s5 = sadd.s32 4294967295, %s2008_s8   ;;  %s2008_s8 = sphi %s2155_s8, %s38_s8  }
   0xf   : > { %p1867_p0 = scmp.ge.s32.totalorder %s2008_s8, 1  ;;  %p770_p1 = scmp.lt.s32.totalorder %s2008_s8, 3 }
  0x11   : > { %p771_p2 = pnand %p1867_p0, %p770_p1 }
  0x12   : > { %s3232_s3 = sld [smem:[#allocation6_spill]] (!%p771_p2)  ;;  %p846_p3 = scmp.lt.s32.totalorder (!%p771_p2), %s1863_s5, 1 }
  0x13   : > { %774 = sbr.rel (%p771_p2) target bundleno = 2750 (0xabe), region = 132  ;;  %s3233_s0 = sld [smem:[#allocation8_spill]] (!%p771_p2) }
  0x14   : > { %s3235_s29 = sld [smem:[#allocation7_spill]] (!%p771_p2) }
  0x15   : > { %s3236_s7 = sld [smem:[#allocation10_spill]] (!%p771_p2) }
  0x16   : > { %s3237_s9 = sld [smem:[#allocation14_spill]] (!%p771_p2) }
  0x17   : > { %s3240_s11 = sld [smem:[#allocation12_spill]] (!%p771_p2) }
  0x18   : > { %v861_v0 = vld [vmem:[%s3232_s3] sm:$0xff]  ;;  %s3247_s5 = smov (!%p846_p3, %s1863_s5), 1  ;;  %vm866_vm0 = vcmask 64512   ;;  %s3234_s3 = sld [smem:[#allocation3_spill]] }
  0x19   : > { %v908_v1 = vld [vmem:[%s3233_s0 + $0x78] sm:$0xff]  ;;  %v907_v2 = vld [vmem:[%s3233_s0 + $0x70] sm:$0xff]  ;;  %885 = vmatpush.msra.mxu0 %v861_v0  ;;  %v906_v3 = vld [vmem:[%s3233_s0 + $0x68] sm:$0xff]  ;;  %s2175_s12 = sshll.u32 %s3247_s5, 3  ;;  %s3241_s10 = sld [smem:[#allocation15_spill]] }
  0x1a   : > { %913 = vmatpush.msra.mxu1 %v908_v1  ;;  %v905_v4 = vld [vmem:[%s3233_s0 + $0x60] sm:$0xff]  ;;  %v904_v5 = vld [vmem:[%s3233_s0 + $0x58] sm:$0xff]  ;;  %v903_v7 = vld [vmem:[%s3233_s0 + $0x50] sm:$0xff]  ;;  %s857_s30 = scalar_lea.vmem %s3209_s28, %s2175_s12 }
  0x1b   : > { %v902_v8 = vld [vmem:[%s3233_s0 + $0x48] sm:$0xff]  ;;  %v901_v9 = vld [vmem:[%s3233_s0 + $0x40] sm:$0xff]  ;;  %v900_v10 = vld [vmem:[%s3233_s0 + $0x38] sm:$0xff] }
  0x1c   : > { %914 = vmatpush.msra.mxu1 %v907_v2  ;;  %v899_v11 = vld [vmem:[%s3233_s0 + $0x30] sm:$0xff]  ;;  %v898_v12 = vld [vmem:[%s3233_s0 + $0x28] sm:$0xff]  ;;  %v897_v13 = vld [vmem:[%s3233_s0 + $0x20] sm:$0xff] }
  0x1d   : > { %v896_v14 = vld [vmem:[%s3233_s0 + $0x18] sm:$0xff]  ;;  %v895_v15 = vld [vmem:[%s3233_s0 + $0x10] sm:$0xff]  ;;  %v894_v16 = vld [vmem:[%s3233_s0 + $0x8] sm:$0xff] }
  0x1e   : > { %s849_s6 = scalar_lea.vmem %s3234_s3, %s2175_s12  ;;  %915 = vmatpush.msra.mxu1 %v906_v3  ;;  %v893_v17 = vld [vmem:[%s3233_s0] sm:$0xff]  ;;  %v975_v23 = vld [vmem:[%s3236_s7 + $0x78] sm:$0xff]  ;;  %v974_v25 = vld [vmem:[%s3236_s7 + $0x70] sm:$0xff]  ;;  %s3243_s0 = sld [smem:[#allocation13_spill]] }
  0x1f   : > { %v858_v6 = vld [vmem:[%s849_s6] sm:$0xff]  ;;  %v1061_v24 = vld [vmem:[%s3237_s9 + $0x78] sm:$0xff]  ;;  %980 = vmatpush.msra.mxu3 %v975_v23  ;;  %v1060_v26 = vld [vmem:[%s3237_s9 + $0x70] sm:$0xff]  ;;  %s3238_s6 = sld [smem:[#allocation9_spill]] }
  0x20   : > { %1871 = vmatmul.msk.f32.vlgmr.msra.gmra.mxu0 %vm866_vm0, %v858_v6  ;;  %916 = vmatpush.msra.mxu1 %v905_v4  ;;  %v1987_v18 = vld [vmem:[%s3235_s29] ss:$0 sm:$0xff]  ;;  %v973_v27 = vld [vmem:[%s3236_s7 + $0x68] sm:$0xff]  ;;  %v971_v31 = vld [vmem:[%s3236_s7 + $0x58] sm:$0xff]  ;;  %s3239_s29 = sld [smem:[#allocation4_spill]] }
  0x21   : > { %v1059_v28 = vld [vmem:[%s3237_s9 + $0x68] sm:$0xff]  ;;  %981 = vmatpush.msra.mxu3 %v974_v25  ;;  %v972_v29 = vld [vmem:[%s3236_s7 + $0x60] sm:$0xff]  ;;  %v1057_v32 = vld [vmem:[%s3237_s9 + $0x58] sm:$0xff] }
  0x22   : > { %917 = vmatpush.msra.mxu1 %v904_v5  ;;  %v1058_v30 = vld [vmem:[%s3237_s9 + $0x60] sm:$0xff]  ;;  %v970_v33 = vld [vmem:[%s3236_s7 + $0x50] sm:$0xff]  ;;  %v969_v35 = vld [vmem:[%s3236_s7 + $0x48] sm:$0xff] }
  0x23   : > { %982 = vmatpush.msra.mxu3 %v973_v27  ;;  %v1056_v34 = vld [vmem:[%s3237_s9 + $0x50] sm:$0xff]  ;;  %v1055_v36 = vld [vmem:[%s3237_s9 + $0x48] sm:$0xff]  ;;  %v968_v37 = vld [vmem:[%s3236_s7 + $0x40] sm:$0xff] }
  0x24   : > { %918 = vmatpush.msra.mxu1 %v903_v7  ;;  %v1054_v38 = vld [vmem:[%s3237_s9 + $0x40] sm:$0xff]  ;;  %v967_v39 = vld [vmem:[%s3236_s7 + $0x38] sm:$0xff]  ;;  %v966_v41 = vld [vmem:[%s3236_s7 + $0x30] sm:$0xff] }
  0x25   : > { %983 = vmatpush.msra.mxu3 %v972_v29  ;;  %v1053_v40 = vld [vmem:[%s3237_s9 + $0x38] sm:$0xff]  ;;  %v1052_v42 = vld [vmem:[%s3237_s9 + $0x30] sm:$0xff]  ;;  %v965_v43 = vld [vmem:[%s3236_s7 + $0x28] sm:$0xff] }
  0x26   : > { %919 = vmatpush.msra.mxu1 %v902_v8  ;;  %v1051_v44 = vld [vmem:[%s3237_s9 + $0x28] sm:$0xff]  ;;  %v1988_v45 = vld [vmem:[%s3238_s6] ss:$0 sm:$0xff]  ;;  %v963_v48 = vld [vmem:[%s3236_s7 + $0x18] sm:$0xff]  ;;  %s853_s2 = scalar_lea.vmem %s3239_s29, %s2175_s12 }
  0x27   : > { %984 = vmatpush.msra.mxu3 %v971_v31  ;;  %v964_v46 = vld [vmem:[%s3236_s7 + $0x20] sm:$0xff]  ;;  %v1049_v49 = vld [vmem:[%s3237_s9 + $0x18] sm:$0xff]  ;;  %v962_v52 = vld [vmem:[%s3236_s7 + $0x10] sm:$0xff] }
  0x28   : > { %920 = vmatpush.msra.mxu1 %v901_v9  ;;  %v1050_v47 = vld [vmem:[%s3237_s9 + $0x20] sm:$0xff]  ;;  %v1048_v53 = vld [vmem:[%s3237_s9 + $0x10] sm:$0xff]  ;;  %v961_v55 = vld [vmem:[%s3236_s7 + $0x8] sm:$0xff] }
  0x29   : > { %985 = vmatpush.msra.mxu3 %v970_v33  ;;  %v1047_v56 = vld [vmem:[%s3237_s9 + $0x8] sm:$0xff]  ;;  %v2321_v58 = vld [vmem:[%s853_s2] sm:$0xff]  ;;  %v1018_v62 = vld [vmem:[%s3240_s11 + $0x78] sm:$0xff] }
  0x2a   : > { %921 = vmatpush.msra.mxu1 %v900_v10  ;;  %v960_v60 = vld [vmem:[%s3236_s7] sm:$0xff]  ;;  %v1017_v63 = vld [vmem:[%s3240_s11 + $0x70] sm:$0xff]  ;;  %1023 = vmatpush.msrb.mxu0 %v1018_v62  ;;  %v1016_v0 = vld [vmem:[%s3240_s11 + $0x68] sm:$0xff]  ;;  %s3242_s7 = sld [smem:[#allocation11_spill]] }
  0x2b   : > { %986 = vmatpush.msra.mxu3 %v969_v35  ;;  %v1046_v61 = vld [vmem:[%s3237_s9] sm:$0xff]  ;;  %v1014_v2 = vld [vmem:[%s3240_s11 + $0x58] sm:$0xff]  ;;  %v1013_v3 = vld [vmem:[%s3240_s11 + $0x50] sm:$0xff] }
  0x2c   : > { %922 = vmatpush.msra.mxu1 %v899_v11  ;;  %1024 = vmatpush.msrb.mxu0 %v1017_v63  ;;  %v1015_v1 = vld [vmem:[%s3240_s11 + $0x60] sm:$0xff]  ;;  %v1012_v4 = vld [vmem:[%s3240_s11 + $0x48] sm:$0xff]  ;;  %v1010_v6 = vld [vmem:[%s3240_s11 + $0x38] sm:$0xff] }
  0x2d   : > { %987 = vmatpush.msra.mxu3 %v968_v37  ;;  %v1011_v5 = vld [vmem:[%s3240_s11 + $0x40] sm:$0xff]  ;;  %v1009_v7 = vld [vmem:[%s3240_s11 + $0x30] sm:$0xff]  ;;  %v1008_v9 = vld [vmem:[%s3240_s11 + $0x28] sm:$0xff] }
  0x2e   : > { %923 = vmatpush.msra.mxu1 %v898_v12  ;;  %1025 = vmatpush.msrb.mxu0 %v1016_v0  ;;  %v1007_v10 = vld [vmem:[%s3240_s11 + $0x20] sm:$0xff]  ;;  %v1006_v11 = vld [vmem:[%s3240_s11 + $0x18] sm:$0xff]  ;;  %v1005_v12 = vld [vmem:[%s3240_s11 + $0x10] sm:$0xff] }
  0x2f   : > { %988 = vmatpush.msra.mxu3 %v967_v39  ;;  %v1069_v23 = vld [vmem:[%s3241_s10 + $0x38] sm:$0xff]  ;;  %v1067_v25 = vld [vmem:[%s3241_s10 + $0x28] sm:$0xff]  ;;  %v1064_v33 = vld [vmem:[%s3241_s10 + $0x10] sm:$0xff] }
  0x30   : > { %924 = vmatpush.msra.mxu1 %v897_v13  ;;  %1026 = vmatpush.msrb.mxu0 %v1015_v1  ;;  %v1004_v13 = vld [vmem:[%s3240_s11 + $0x8] sm:$0xff]  ;;  %v1065_v27 = vld [vmem:[%s3241_s10 + $0x18] sm:$0xff]  ;;  %v1062_v35 = vld [vmem:[%s3241_s10] sm:$0xff] }
  0x31   : > { %989 = vmatpush.msra.mxu3 %v966_v41  ;;  %v1140_v37 = vld [vmem:[%s3195_s14 + $0x70] sm:$0xff]  ;;  %v1138_v39 = vld [vmem:[%s3195_s14 + $0x60] sm:$0xff]  ;;  %v1181_v63 = vld [vmem:[%s3198_s17 + $0x58] sm:$0xff] }
  0x32   : > { %925 = vmatpush.msra.mxu1 %v896_v14  ;;  %1027 = vmatpush.msrb.mxu0 %v1014_v2  ;;  %v1003_v14 = vld [vmem:[%s3240_s11] sm:$0xff]  ;;  %v1136_v41 = vld [vmem:[%s3195_s14 + $0x50] sm:$0xff]  ;;  %v1179_v1 = vld [vmem:[%s3198_s17 + $0x48] sm:$0xff] }
  0x33   : > { %990 = vmatpush.msra.mxu3 %v965_v43  ;;  %v1134_v43 = vld [vmem:[%s3195_s14 + $0x40] sm:$0xff]  ;;  %v1180_v0 = vld [vmem:[%s3198_s17 + $0x50] sm:$0xff] }
  0x34   : > { %926 = vmatpush.msra.mxu1 %v895_v15  ;;  %1028 = vmatpush.msrb.mxu0 %v1013_v3  ;;  %v1077_v15 = vld [vmem:[%s3241_s10 + $0x78] sm:$0xff]  ;;  %v1182_v62 = vld [vmem:[%s3198_s17 + $0x60] sm:$0xff] }
  0x35   : > { %991 = vmatpush.msra.mxu3 %v964_v46  ;;  %v1131_v46 = vld [vmem:[%s3195_s14 + $0x28] sm:$0xff]  ;;  %v1178_v2 = vld [vmem:[%s3198_s17 + $0x40] sm:$0xff]  ;;  %v1177_v3 = vld [vmem:[%s3198_s17 + $0x38] sm:$0xff] }
  0x36   : > { %927 = vmatpush.msra.mxu1 %v894_v16  ;;  %1029 = vmatpush.msrb.mxu0 %v1012_v4  ;;  %v1076_v16 = vld [vmem:[%s3241_s10 + $0x70] sm:$0xff] }
  0x37   : > { %992 = vmatpush.msra.mxu3 %v963_v48  ;;  %v1990_v48 = vld [vmem:[%s3243_s0] ss:$0 sm:$0xff]  ;;  %v1176_v4 = vld [vmem:[%s3198_s17 + $0x30] sm:$0xff] }
  0x38   : > { %928 = vmatpush.msra.mxu1 %v893_v17  ;;  %1030 = vmatpush.msrb.mxu0 %v1011_v5  ;;  %v1075_v17 = vld [vmem:[%s3241_s10 + $0x68] sm:$0xff] }
  0x39   : > { %993 = vmatpush.msra.mxu3 %v962_v52  ;;  %v1175_v5 = vld [vmem:[%s3198_s17 + $0x28] sm:$0xff] }
  0x3a   : > { %1098 = vmatpush.msrb.mxu1 %v1061_v24  ;;  %1031 = vmatpush.msrb.mxu0 %v1010_v6  ;;  %v1068_v24 = vld [vmem:[%s3241_s10 + $0x30] sm:$0xff]  ;;  %v1174_v6 = vld [vmem:[%s3198_s17 + $0x20] sm:$0xff] }
  0x3b   : > { %994 = vmatpush.msra.mxu3 %v961_v55  ;;  %v1127_v55 = vld [vmem:[%s3195_s14 + $0x8] sm:$0xff] }
  0x3c   : > { %1099 = vmatpush.msrb.mxu1 %v1060_v26  ;;  %1032 = vmatpush.msrb.mxu0 %v1009_v7  ;;  %v1066_v26 = vld [vmem:[%s3241_s10 + $0x20] sm:$0xff]  ;;  %v1173_v7 = vld [vmem:[%s3198_s17 + $0x18] sm:$0xff] }
  0x3d   : > { %995 = vmatpush.msra.mxu3 %v960_v60  ;;  %v1184_v60 = vld [vmem:[%s3198_s17 + $0x70] sm:$0xff] }
  0x3e   : > { %1100 = vmatpush.msrb.mxu1 %v1059_v28  ;;  %1033 = vmatpush.msrb.mxu0 %v1008_v9  ;;  %v1989_v28 = vld [vmem:[%s3242_s7] ss:$0 sm:$0xff]  ;;  %s3244_s7 = sld [smem:[#allocation5_spill]] }
  0x40   : > { %1101 = vmatpush.msrb.mxu1 %v1058_v30  ;;  %1034 = vmatpush.msrb.mxu0 %v1007_v10 }
  0x42   : > { %1102 = vmatpush.msrb.mxu1 %v1057_v32  ;;  %1035 = vmatpush.msrb.mxu0 %v1006_v11  ;;  %v1172_v11 = vld [vmem:[%s3198_s17 + $0x10] sm:$0xff] }
  0x44   : > { %1103 = vmatpush.msrb.mxu1 %v1056_v34  ;;  %1036 = vmatpush.msrb.mxu0 %v1005_v12  ;;  %v1063_v34 = vld [vmem:[%s3241_s10 + $0x8] sm:$0xff] }
  0x46   : > { %1104 = vmatpush.msrb.mxu1 %v1055_v36  ;;  %1037 = vmatpush.msrb.mxu0 %v1004_v13  ;;  %v1141_v36 = vld [vmem:[%s3195_s14 + $0x78] sm:$0xff]  ;;  %v1171_v13 = vld [vmem:[%s3198_s17 + $0x8] sm:$0xff] }
  0x47   : > { %1146 = vmatpush.msrb.mxu3 %v1141_v36 }
  0x48   : > { %1105 = vmatpush.msrb.mxu1 %v1054_v38  ;;  %1038 = vmatpush.msrb.mxu0 %v1003_v14  ;;  %v1139_v38 = vld [vmem:[%s3195_s14 + $0x68] sm:$0xff] }
  0x49   : > { %1147 = vmatpush.msrb.mxu3 %v1140_v37 }
  0x4a   : > { %1106 = vmatpush.msrb.mxu1 %v1053_v40  ;;  %v1137_v40 = vld [vmem:[%s3195_s14 + $0x58] sm:$0xff] }
  0x4b   : > { %1148 = vmatpush.msrb.mxu3 %v1139_v38 }
  0x4c   : > { %1107 = vmatpush.msrb.mxu1 %v1052_v42  ;;  %v1135_v42 = vld [vmem:[%s3195_s14 + $0x48] sm:$0xff] }
  0x4d   : > { %1149 = vmatpush.msrb.mxu3 %v1138_v39 }
  0x4e   : > { %1108 = vmatpush.msrb.mxu1 %v1051_v44  ;;  %v1133_v44 = vld [vmem:[%s3195_s14 + $0x38] sm:$0xff] }
  0x4f   : > { %1150 = vmatpush.msrb.mxu3 %v1137_v40  ;;  %v1993_v40 = vld [vmem:[%s3199_s18] ss:$0 sm:$0xff] }
  0x50   : > { %1109 = vmatpush.msrb.mxu1 %v1050_v47  ;;  %v1130_v47 = vld [vmem:[%s3195_s14 + $0x20] sm:$0xff] }
  0x51   : > { %1151 = vmatpush.msrb.mxu3 %v1136_v41 }
  0x52   : > { %1110 = vmatpush.msrb.mxu1 %v1049_v49 }
  0x53   : > { %1152 = vmatpush.msrb.mxu3 %v1135_v42 }
  0x54   : > { %1111 = vmatpush.msrb.mxu1 %v1048_v53  ;;  %v1129_v53 = vld [vmem:[%s3195_s14 + $0x18] sm:$0xff] }
  0x55   : > { %1153 = vmatpush.msrb.mxu3 %v1134_v43  ;;  %v1248_v43 = vld [vmem:[%s3197_s16 + $0x78] sm:$0xff] }
  0x56   : > { %1112 = vmatpush.msrb.mxu1 %v1047_v56  ;;  %v1126_v56 = vld [vmem:[%s3195_s14] sm:$0xff] }
  0x57   : > { %1154 = vmatpush.msrb.mxu3 %v1133_v44  ;;  %v2603_v44 = vld [vmem:[%s3244_s7] sm:$0xff] }
  0x58   : > { %1113 = vmatpush.msrb.mxu1 %v1046_v61  ;;  %v1183_v61 = vld [vmem:[%s3198_s17 + $0x68] sm:$0xff] }
  0x9d   : > { %v887_v19 = vpop.f32.mrf.mxu0 }
  0x9e   : > { %v888_v20 = vadd.f32 %v1987_v18, %v887_v19  ;;  %v1074_v18 = vld [vmem:[%s3241_s10 + $0x60] sm:$0xff]  ;;  %v1073_v19 = vld [vmem:[%s3241_s10 + $0x58] sm:$0xff] }
  0xa0   : > { %vm890_vm1 = vcmp.ge.f32.partialorder %v888_v20, 0.0  ;;  %v891_v21 = vmul.f32 0.01, %v888_v20 }
  0xa2   : > { %v892_v22 = vsel %vm890_vm1, %v888_v20, %v891_v21  ;;  %v1072_v20 = vld [vmem:[%s3241_s10 + $0x50] sm:$0xff]  ;;  %v1071_v21 = vld [vmem:[%s3241_s10 + $0x48] sm:$0xff] }
  0xa3   : > { %929 = vmatmul.f32.vlgmr.msra.gmra.mxu1 %v892_v22 }
 0x120   : > { %v930_v50 = vpop.f32.mrf.mxu1 }
 0x121   : > { %v931_v51 = vadd.f32 %v1988_v45, %v930_v50  ;;  %v1132_v45 = vld [vmem:[%s3195_s14 + $0x30] sm:$0xff] }
 0x122   : > { %1155 = vmatpush.msrb.mxu3 %v1132_v45  ;;  %v1247_v45 = vld [vmem:[%s3197_s16 + $0x70] sm:$0xff] }
 0x123   : > { %v933_v54 = vadd.f32 %v931_v51, %v892_v22  ;;  %v1070_v22 = vld [vmem:[%s3241_s10 + $0x40] sm:$0xff] }
 0x124   : > { %1156 = vmatpush.msrb.mxu3 %v1131_v46  ;;  %v1287_v46 = vld [vmem:[%s3200_s19 + $0x78] sm:$0xff] }
 0x125   : > { %vm934_vm2 = vcmp.ge.f32.partialorder %v933_v54, 0.0  ;;  %v935_v57 = vmul.f32 0.01, %v933_v54  ;;  %1292 = vmatpush.msra.mxu1 %v1287_v46  ;;  %v1954_v46 = vld [vmem:[%s3197_s16 + $0xd8] sm:$0xff] }
 0x126   : > { %1157 = vmatpush.msrb.mxu3 %v1130_v47  ;;  %v1286_v47 = vld [vmem:[%s3200_s19 + $0x70] sm:$0xff] }
 0x127   : > { %v2323_v59 = vsel %vm934_vm2, %v933_v54, %v935_v57  ;;  %v1128_v54 = vld [vmem:[%s3195_s14 + $0x10] sm:$0xff]  ;;  %v1185_v57 = vld [vmem:[%s3198_s17 + $0x78] sm:$0xff]  ;;  %1293 = vmatpush.msra.mxu1 %v1286_v47 }
 0x128   : > { %955 = vmatpush.msra.mxu2 %v2323_v59  ;;  %1158 = vmatpush.msrb.mxu3 %v1129_v53  ;;  %v1283_v53 = vld [vmem:[%s3200_s19 + $0x58] sm:$0xff]  ;;  %v1953_v47 = vld [vmem:[%s3197_s16 + $0xd0] sm:$0xff] }
 0x129   : > { %1872 = vmatmul.msk.f32.vlgmr.msra.gmra.mxu2 %vm866_vm0, %v2321_v58  ;;  %1190 = vmatpush.msra.mxu0 %v1185_v57  ;;  %v1281_v57 = vld [vmem:[%s3200_s19 + $0x48] sm:$0xff] }
 0x12a   : > { %1078 = vmatpush.msrb.mxu2 %v1077_v15  ;;  %1159 = vmatpush.msrb.mxu3 %v1128_v54  ;;  %v1170_v15 = vld [vmem:[%s3198_s17] sm:$0xff]  ;;  %v1243_v54 = vld [vmem:[%s3197_s16 + $0x50] sm:$0xff] }
 0x12b   : > { %1191 = vmatpush.msra.mxu0 %v1184_v60  ;;  %v1241_v60 = vld [vmem:[%s3197_s16 + $0x40] sm:$0xff] }
 0x12c   : > { %1079 = vmatpush.msrb.mxu2 %v1076_v16  ;;  %1160 = vmatpush.msrb.mxu3 %v1127_v55  ;;  %v1282_v55 = vld [vmem:[%s3200_s19 + $0x50] sm:$0xff] }
 0x12d   : > { %1192 = vmatpush.msra.mxu0 %v1183_v61  ;;  %v1280_v61 = vld [vmem:[%s3200_s19 + $0x40] sm:$0xff] }
 0x12e   : > { %1080 = vmatpush.msrb.mxu2 %v1075_v17  ;;  %1161 = vmatpush.msrb.mxu3 %v1126_v56  ;;  %v1906_v17 = vld [vmem:[%s3241_s10 + $0xf8] sm:$0xff]  ;;  %v1242_v56 = vld [vmem:[%s3197_s16 + $0x48] sm:$0xff] }
 0x12f   : > { %1193 = vmatpush.msra.mxu0 %v1182_v62  ;;  %v1240_v62 = vld [vmem:[%s3197_s16 + $0x38] sm:$0xff] }
 0x130   : > { %1081 = vmatpush.msrb.mxu2 %v1074_v18 }
 0x131   : > { %1194 = vmatpush.msra.mxu0 %v1181_v63  ;;  %v1279_v63 = vld [vmem:[%s3200_s19 + $0x38] sm:$0xff] }
 0x132   : > { %1082 = vmatpush.msrb.mxu2 %v1073_v19  ;;  %v1905_v19 = vld [vmem:[%s3241_s10 + $0xf0] sm:$0xff] }
 0x133   : > { %1195 = vmatpush.msra.mxu0 %v1180_v0  ;;  %v1239_v0 = vld [vmem:[%s3197_s16 + $0x30] sm:$0xff] }
 0x134   : > { %1083 = vmatpush.msrb.mxu2 %v1072_v20  ;;  %v1904_v20 = vld [vmem:[%s3241_s10 + $0xe8] sm:$0xff] }
 0x135   : > { %1196 = vmatpush.msra.mxu0 %v1179_v1  ;;  %v1238_v1 = vld [vmem:[%s3197_s16 + $0x28] sm:$0xff] }
 0x136   : > { %1084 = vmatpush.msrb.mxu2 %v1071_v21  ;;  %v1903_v21 = vld [vmem:[%s3241_s10 + $0xe0] sm:$0xff] }
 0x137   : > { %1197 = vmatpush.msra.mxu0 %v1178_v2  ;;  %v1237_v2 = vld [vmem:[%s3197_s16 + $0x20] sm:$0xff] }
 0x138   : > { %1085 = vmatpush.msrb.mxu2 %v1070_v22  ;;  %v1902_v22 = vld [vmem:[%s3241_s10 + $0xd8] sm:$0xff] }
 0x139   : > { %1198 = vmatpush.msra.mxu0 %v1177_v3  ;;  %v1236_v3 = vld [vmem:[%s3197_s16 + $0x18] sm:$0xff] }
 0x13a   : > { %1086 = vmatpush.msrb.mxu2 %v1069_v23  ;;  %v1901_v23 = vld [vmem:[%s3241_s10 + $0xd0] sm:$0xff] }
 0x13b   : > { %1199 = vmatpush.msra.mxu0 %v1176_v4  ;;  %v1235_v4 = vld [vmem:[%s3197_s16 + $0x10] sm:$0xff] }
 0x13c   : > { %1087 = vmatpush.msrb.mxu2 %v1068_v24  ;;  %v1900_v24 = vld [vmem:[%s3241_s10 + $0xc8] sm:$0xff] }
 0x13d   : > { %1200 = vmatpush.msra.mxu0 %v1175_v5  ;;  %v1234_v5 = vld [vmem:[%s3197_s16 + $0x8] sm:$0xff] }
 0x13e   : > { %1088 = vmatpush.msrb.mxu2 %v1067_v25  ;;  %v1899_v25 = vld [vmem:[%s3241_s10 + $0xc0] sm:$0xff] }
 0x13f   : > { %1201 = vmatpush.msra.mxu0 %v1174_v6  ;;  %v1233_v6 = vld [vmem:[%s3197_s16] sm:$0xff] }
 0x140   : > { %1089 = vmatpush.msrb.mxu2 %v1066_v26  ;;  %v1898_v26 = vld [vmem:[%s3241_s10 + $0xb8] sm:$0xff] }
 0x141   : > { %1202 = vmatpush.msra.mxu0 %v1173_v7  ;;  %v1278_v7 = vld [vmem:[%s3200_s19 + $0x30] sm:$0xff] }
 0x142   : > { %1090 = vmatpush.msrb.mxu2 %v1065_v27  ;;  %v1897_v27 = vld [vmem:[%s3241_s10 + $0xb0] sm:$0xff] }
 0x143   : > { %1203 = vmatpush.msra.mxu0 %v1172_v11  ;;  %v1274_v11 = vld [vmem:[%s3200_s19 + $0x10] sm:$0xff] }
 0x144   : > { %1091 = vmatpush.msrb.mxu2 %v1064_v33  ;;  %v1891_v33 = vld [vmem:[%s3241_s10 + $0x80] sm:$0xff] }
 0x145   : > { %1204 = vmatpush.msra.mxu0 %v1171_v13  ;;  %v1272_v13 = vld [vmem:[%s3200_s19] sm:$0xff] }
 0x146   : > { %1092 = vmatpush.msrb.mxu2 %v1063_v34  ;;  %v1992_v34 = vld [vmem:[%s3196_s15] ss:$0 sm:$0xff] }
 0x147   : > { %1205 = vmatpush.msra.mxu0 %v1170_v15 }
 0x148   : > { %1093 = vmatpush.msrb.mxu2 %v1062_v35 }
 0x1ac   : > { %v957_v8 = vpop.f32.mrf.mxu2 }
 0x1ad   : > { %996 = vmatmul.f32.vlgmr.msra.gmra.mxu3 %v957_v8  ;;  %1114 = vmatmul.f32.vlgmr.msrb.gmra.mxu1 %v957_v8  ;;  %v1991_v8 = vld [vmem:[%s3194_s13] ss:$0 sm:$0xff] }
 0x22a   : > { %v1115_v9 = vpop.f32.mrf.mxu1 }
 0x230   : > { %v997_v29 = vpop.f32.mrf.mxu3 }
 0x231   : > { %v998_v30 = vadd.f32 %v1989_v28, %v997_v29  ;;  %v1896_v28 = vld [vmem:[%s3241_s10 + $0xa8] sm:$0xff]  ;;  %v1895_v29 = vld [vmem:[%s3241_s10 + $0xa0] sm:$0xff] }
 0x233   : > { %v1001_v31 = vmul.f32 0.01, %v998_v30  ;;  %vm1000_vm3 = vcmp.ge.f32.partialorder %v998_v30, 0.0 }
 0x235   : > { %v1002_v32 = vsel %vm1000_vm3, %v998_v30, %v1001_v31  ;;  %v1894_v30 = vld [vmem:[%s3241_s10 + $0x98] sm:$0xff]  ;;  %v1893_v31 = vld [vmem:[%s3241_s10 + $0x90] sm:$0xff] }
 0x236   : > { %1039 = vmatmul.f32.vlgmr.msrb.gmra.mxu0 %v1002_v32  ;;  %v1892_v32 = vld [vmem:[%s3241_s10 + $0x88] sm:$0xff] }
 0x237   : > { %1370 = vmatpush.msrb.mxu0 %v1906_v17 }
 0x239   : > { %1371 = vmatpush.msrb.mxu0 %v1905_v19  ;;  %v1890_v19 = vld [vmem:[%s3237_s9 + $0xf8] sm:$0xff] }
 0x23a   : > { %1390 = vmatpush.msra.mxu3 %v1890_v19  ;;  %v1934_v19 = vld [vmem:[%s3198_s17 + $0xc8] sm:$0xff] }
 0x23b   : > { %1372 = vmatpush.msrb.mxu0 %v1904_v20  ;;  %v1889_v20 = vld [vmem:[%s3237_s9 + $0xf0] sm:$0xff] }
 0x23c   : > { %1391 = vmatpush.msra.mxu3 %v1889_v20  ;;  %v1933_v20 = vld [vmem:[%s3198_s17 + $0xc0] sm:$0xff] }
 0x23d   : > { %1373 = vmatpush.msrb.mxu0 %v1903_v21  ;;  %v1888_v21 = vld [vmem:[%s3237_s9 + $0xe8] sm:$0xff] }
 0x23e   : > { %1392 = vmatpush.msra.mxu3 %v1888_v21  ;;  %v1932_v21 = vld [vmem:[%s3198_s17 + $0xb8] sm:$0xff] }
 0x23f   : > { %1374 = vmatpush.msrb.mxu0 %v1902_v22  ;;  %v1887_v22 = vld [vmem:[%s3237_s9 + $0xe0] sm:$0xff] }
 0x240   : > { %1393 = vmatpush.msra.mxu3 %v1887_v22  ;;  %v1931_v22 = vld [vmem:[%s3198_s17 + $0xb0] sm:$0xff] }
 0x241   : > { %1375 = vmatpush.msrb.mxu0 %v1901_v23  ;;  %v1886_v23 = vld [vmem:[%s3237_s9 + $0xd8] sm:$0xff] }
 0x242   : > { %1394 = vmatpush.msra.mxu3 %v1886_v23  ;;  %v1930_v23 = vld [vmem:[%s3198_s17 + $0xa8] sm:$0xff] }
 0x243   : > { %1376 = vmatpush.msrb.mxu0 %v1900_v24  ;;  %v1885_v24 = vld [vmem:[%s3237_s9 + $0xd0] sm:$0xff] }
 0x244   : > { %1395 = vmatpush.msra.mxu3 %v1885_v24  ;;  %v1929_v24 = vld [vmem:[%s3198_s17 + $0xa0] sm:$0xff] }
 0x245   : > { %1377 = vmatpush.msrb.mxu0 %v1899_v25  ;;  %v1884_v25 = vld [vmem:[%s3237_s9 + $0xc8] sm:$0xff] }
 0x246   : > { %1396 = vmatpush.msra.mxu3 %v1884_v25  ;;  %v1995_v25 = vld [vmem:[%s3194_s13 + $0x1] ss:$0 sm:$0xff] }
 0x247   : > { %1378 = vmatpush.msrb.mxu0 %v1898_v26  ;;  %v1883_v26 = vld [vmem:[%s3237_s9 + $0xc0] sm:$0xff] }
 0x248   : > { %1397 = vmatpush.msra.mxu3 %v1883_v26 }
 0x249   : > { %1379 = vmatpush.msrb.mxu0 %v1897_v27  ;;  %v1882_v27 = vld [vmem:[%s3237_s9 + $0xb8] sm:$0xff] }
 0x24a   : > { %1398 = vmatpush.msra.mxu3 %v1882_v27 }
 0x24b   : > { %1380 = vmatpush.msrb.mxu0 %v1896_v28  ;;  %v1881_v28 = vld [vmem:[%s3237_s9 + $0xb0] sm:$0xff] }
 0x24c   : > { %1399 = vmatpush.msra.mxu3 %v1881_v28 }
 0x24d   : > { %1381 = vmatpush.msrb.mxu0 %v1895_v29  ;;  %v1880_v29 = vld [vmem:[%s3237_s9 + $0xa8] sm:$0xff] }
 0x24e   : > { %1400 = vmatpush.msra.mxu3 %v1880_v29 }
 0x24f   : > { %1382 = vmatpush.msrb.mxu0 %v1894_v30  ;;  %v1994_v30 = vld [vmem:[%s3201_s20] ss:$0 sm:$0xff] }
 0x251   : > { %1383 = vmatpush.msrb.mxu0 %v1893_v31  ;;  %v1879_v31 = vld [vmem:[%s3237_s9 + $0xa0] sm:$0xff] }
 0x252   : > { %1401 = vmatpush.msra.mxu3 %v1879_v31 }
 0x253   : > { %1384 = vmatpush.msrb.mxu0 %v1892_v32  ;;  %v1878_v32 = vld [vmem:[%s3237_s9 + $0x98] sm:$0xff] }
 0x254   : > { %1402 = vmatpush.msra.mxu3 %v1878_v32  ;;  %v1928_v32 = vld [vmem:[%s3198_s17 + $0x98] sm:$0xff] }
 0x255   : > { %1385 = vmatpush.msrb.mxu0 %v1891_v33 }
 0x2b3   : > { %v1040_v49 = vpop.f32.mrf.mxu0 }
 0x2b4   : > { %v1041_v50 = vadd.f32 %v1990_v48, %v1040_v49  ;;  %v1246_v48 = vld [vmem:[%s3197_s16 + $0x68] sm:$0xff] }
 0x2b5   : > { %v1285_v49 = vld [vmem:[%s3200_s19 + $0x68] sm:$0xff] }
 0x2b6   : > { %v1044_v51 = vmul.f32 0.01, %v1041_v50  ;;  %vm1043_vm4 = vcmp.ge.f32.partialorder %v1041_v50, 0.0  ;;  %1294 = vmatpush.msra.mxu1 %v1285_v49  ;;  %v1951_v49 = vld [vmem:[%s3197_s16 + $0xc0] sm:$0xff] }
 0x2b8   : > { %v2472_v52 = vsel %vm1043_vm4, %v1041_v50, %v1044_v51  ;;  %v1245_v50 = vld [vmem:[%s3197_s16 + $0x60] sm:$0xff] }
 0x2b9   : > { %1094 = vmatmul.f32.vlgmr.msrb.gmra.mxu2 %v2472_v52  ;;  %v1284_v51 = vld [vmem:[%s3200_s19 + $0x60] sm:$0xff] }
 0x2ba   : > { %1295 = vmatpush.msra.mxu1 %v1284_v51  ;;  %v1949_v51 = vld [vmem:[%s3197_s16 + $0xb0] sm:$0xff] }
 0x2bc   : > { %1296 = vmatpush.msra.mxu1 %v1283_v53  ;;  %v1947_v53 = vld [vmem:[%s3197_s16 + $0xa0] sm:$0xff] }
 0x2be   : > { %1297 = vmatpush.msra.mxu1 %v1282_v55  ;;  %v1945_v55 = vld [vmem:[%s3197_s16 + $0x90] sm:$0xff] }
 0x2c0   : > { %1298 = vmatpush.msra.mxu1 %v1281_v57  ;;  %v1943_v57 = vld [vmem:[%s3197_s16 + $0x80] sm:$0xff] }
 0x2c2   : > { %1299 = vmatpush.msra.mxu1 %v1280_v61  ;;  %v1922_v61 = vld [vmem:[%s3195_s14 + $0xf0] sm:$0xff] }
 0x2c4   : > { %1300 = vmatpush.msra.mxu1 %v1279_v63  ;;  %v1920_v63 = vld [vmem:[%s3195_s14 + $0xe0] sm:$0xff] }
 0x2c6   : > { %1301 = vmatpush.msra.mxu1 %v1278_v7  ;;  %v1912_v7 = vld [vmem:[%s3195_s14 + $0xa0] sm:$0xff] }
 0x33c   : > { %v1095_v10 = vpop.f32.mrf.mxu2 }
 0x33d   : > { %v1116_v12 = vadd.f32 %v1115_v9, %v1095_v10  ;;  %v1276_v9 = vld [vmem:[%s3200_s19 + $0x20] sm:$0xff]  ;;  %v1275_v10 = vld [vmem:[%s3200_s19 + $0x18] sm:$0xff] }
 0x33f   : > { %v1122_v14 = vadd.f32 %v1991_v8, %v1116_v12  ;;  %v1277_v8 = vld [vmem:[%s3200_s19 + $0x28] sm:$0xff] }
 0x340   : > { %1302 = vmatpush.msra.mxu1 %v1277_v8  ;;  %v1273_v12 = vld [vmem:[%s3200_s19 + $0x8] sm:$0xff] }
 0x341   : > { %vm1123_vm5 = vcmp.ge.f32.partialorder %v1122_v14, 0.0  ;;  %v1124_v16 = vmul.f32 0.01, %v1122_v14 }
 0x342   : > { %1303 = vmatpush.msra.mxu1 %v1276_v9  ;;  %v1911_v9 = vld [vmem:[%s3195_s14 + $0x98] sm:$0xff] }
 0x343   : > { %v1125_v18 = vsel %vm1123_vm5, %v1122_v14, %v1124_v16 }
 0x344   : > { %1162 = vmatmul.f32.vlgmr.msrb.gmra.mxu3 %v1125_v18  ;;  %1304 = vmatpush.msra.mxu1 %v1275_v10  ;;  %v1910_v10 = vld [vmem:[%s3195_s14 + $0x90] sm:$0xff] }
 0x346   : > { %1305 = vmatpush.msra.mxu1 %v1274_v11  ;;  %v1909_v11 = vld [vmem:[%s3195_s14 + $0x88] sm:$0xff] }
 0x348   : > { %1306 = vmatpush.msra.mxu1 %v1273_v12  ;;  %v1908_v12 = vld [vmem:[%s3195_s14 + $0x80] sm:$0xff] }
 0x34a   : > { %1307 = vmatpush.msra.mxu1 %v1272_v13  ;;  %v1940_v13 = vld [vmem:[%s3198_s17 + $0xf8] sm:$0xff] }
 0x34c   : > { %1487 = vmatpush.msrb.mxu1 %v1940_v13  ;;  %v1662_v13 = vld [vmem:[%s3203_s22 + $0x68] sm:$0xff] }
 0x3c7   : > { %v1163_v35 = vpop.f32.mrf.mxu3 }
 0x3c8   : > { %v1164_v36 = vadd.f32 %v1992_v34, %v1163_v35  ;;  %v1877_v35 = vld [vmem:[%s3237_s9 + $0x90] sm:$0xff] }
 0x3c9   : > { %1403 = vmatpush.msra.mxu3 %v1877_v35  ;;  %v1925_v35 = vld [vmem:[%s3198_s17 + $0x80] sm:$0xff] }
 0x3ca   : > { %v1166_v37 = vadd.f32 %v1164_v36, %v2472_v52  ;;  %v1244_v52 = vld [vmem:[%s3197_s16 + $0x58] sm:$0xff] }
 0x3cc   : > { %v1168_v38 = vmul.f32 0.01, %v1166_v37  ;;  %vm1167_vm6 = vcmp.ge.f32.partialorder %v1166_v37, 0.0 }
 0x3ce   : > { %v2590_v39 = vsel %vm1167_vm6, %v1166_v37, %v1168_v38  ;;  %v1876_v37 = vld [vmem:[%s3237_s9 + $0x88] sm:$0xff] }
 0x3cf   : > { %1206 = vmatmul.f32.vlgmr.msra.gmra.mxu0 %v2590_v39  ;;  %1404 = vmatpush.msra.mxu3 %v1876_v37 }
 0x3d7   : > { %1386 = vmatmul.f32.vlgmr.msrb.gmra.mxu0 %v2590_v39 }
 0x44c   : > { %v1207_v41 = vpop.f32.mrf.mxu0 }
 0x44d   : > { %v1208_v42 = vadd.f32 %v1993_v40, %v1207_v41  ;;  %v1875_v40 = vld [vmem:[%s3237_s9 + $0x80] sm:$0xff]  ;;  %v1958_v41 = vld [vmem:[%s3197_s16 + $0xf8] sm:$0xff] }
 0x44e   : > { %1405 = vmatpush.msra.mxu3 %v1875_v40 }
 0x44f   : > { %1228 = vmatpush.msra.mxu2 %v1208_v42 }
 0x450   : > { %1873 = vmatmul.msk.f32.vlgmr.msra.gmra.mxu2 %vm866_vm0, %v2603_v44  ;;  %1544 = vmatpush.msrb.mxu3 %v1958_v41 }
 0x451   : > { %1249 = vmatpush.msrb.mxu2 %v1248_v43  ;;  %v1956_v43 = vld [vmem:[%s3197_s16 + $0xe8] sm:$0xff] }
 0x453   : > { %1250 = vmatpush.msrb.mxu2 %v1247_v45  ;;  %v1955_v45 = vld [vmem:[%s3197_s16 + $0xe0] sm:$0xff] }
 0x454   : > { %v1387_v26 = vpop.f32.mrf.mxu0 }
 0x455   : > { %1251 = vmatpush.msrb.mxu2 %v1246_v48  ;;  %v1952_v48 = vld [vmem:[%s3197_s16 + $0xc8] sm:$0xff] }
 0x457   : > { %1252 = vmatpush.msrb.mxu2 %v1245_v50  ;;  %v1950_v50 = vld [vmem:[%s3197_s16 + $0xb8] sm:$0xff] }
 0x459   : > { %1253 = vmatpush.msrb.mxu2 %v1244_v52  ;;  %v1948_v52 = vld [vmem:[%s3197_s16 + $0xa8] sm:$0xff] }
 0x45b   : > { %1254 = vmatpush.msrb.mxu2 %v1243_v54  ;;  %v1946_v54 = vld [vmem:[%s3197_s16 + $0x98] sm:$0xff] }
 0x45d   : > { %1255 = vmatpush.msrb.mxu2 %v1242_v56  ;;  %v1944_v56 = vld [vmem:[%s3197_s16 + $0x88] sm:$0xff] }
 0x45f   : > { %1256 = vmatpush.msrb.mxu2 %v1241_v60  ;;  %v1923_v60 = vld [vmem:[%s3195_s14 + $0xf8] sm:$0xff] }
 0x461   : > { %1257 = vmatpush.msrb.mxu2 %v1240_v62  ;;  %v1921_v62 = vld [vmem:[%s3195_s14 + $0xe8] sm:$0xff] }
 0x463   : > { %1258 = vmatpush.msrb.mxu2 %v1239_v0  ;;  %v1919_v0 = vld [vmem:[%s3195_s14 + $0xd8] sm:$0xff] }
 0x465   : > { %1259 = vmatpush.msrb.mxu2 %v1238_v1  ;;  %v1918_v1 = vld [vmem:[%s3195_s14 + $0xd0] sm:$0xff] }
 0x467   : > { %1260 = vmatpush.msrb.mxu2 %v1237_v2  ;;  %v1917_v2 = vld [vmem:[%s3195_s14 + $0xc8] sm:$0xff] }
 0x469   : > { %1261 = vmatpush.msrb.mxu2 %v1236_v3  ;;  %v1916_v3 = vld [vmem:[%s3195_s14 + $0xc0] sm:$0xff] }
 0x46b   : > { %1262 = vmatpush.msrb.mxu2 %v1235_v4  ;;  %v1915_v4 = vld [vmem:[%s3195_s14 + $0xb8] sm:$0xff] }
 0x46d   : > { %1263 = vmatpush.msrb.mxu2 %v1234_v5  ;;  %v1914_v5 = vld [vmem:[%s3195_s14 + $0xb0] sm:$0xff] }
 0x46f   : > { %1264 = vmatpush.msrb.mxu2 %v1233_v6  ;;  %v1913_v6 = vld [vmem:[%s3195_s14 + $0xa8] sm:$0xff] }
 0x470   : > { %1265 = vmatmul.f32.vlgmr.msrb.gmra.mxu2 %v2323_v59 }
 0x4d3   : > { %v1230_v14 = vpop.f32.mrf.mxu2 }
 0x4f3   : > { %v1266_v15 = vpop.f32.mrf.mxu2 }
 0x4f4   : > { %v1267_v16 = vadd.f32 %v1266_v15, %v1230_v14  ;;  %v1939_v14 = vld [vmem:[%s3198_s17 + $0xf0] sm:$0xff]  ;;  %v1938_v15 = vld [vmem:[%s3198_s17 + $0xe8] sm:$0xff] }
 0x4f5   : > { %1488 = vmatpush.msrb.mxu1 %v1939_v14  ;;  %v1661_v14 = vld [vmem:[%s3203_s22 + $0x60] sm:$0xff] }
 0x4f6   : > { %vm1269_vm7 = vcmp.ge.f32.partialorder %v1267_v16, 0.0  ;;  %v1270_v17 = vmul.f32 0.01, %v1267_v16 }
 0x4f7   : > { %1489 = vmatpush.msrb.mxu1 %v1938_v15  ;;  %v1645_v15 = vld [vmem:[%s3202_s21 + $0x60] sm:$0xff] }
 0x4f8   : > { %v1271_v18 = vsel %vm1269_vm7, %v1267_v16, %v1270_v17  ;;  %v1937_v16 = vld [vmem:[%s3198_s17 + $0xe0] sm:$0xff]  ;;  %v1936_v17 = vld [vmem:[%s3198_s17 + $0xd8] sm:$0xff] }
 0x4f9   : > { %1308 = vmatmul.f32.vlgmr.msra.gmra.mxu1 %v1271_v18  ;;  %v1935_v18 = vld [vmem:[%s3198_s17 + $0xd0] sm:$0xff] }
 0x4fa   : > { %1490 = vmatpush.msrb.mxu1 %v1937_v16  ;;  %v1660_v16 = vld [vmem:[%s3203_s22 + $0x58] sm:$0xff] }
 0x4fc   : > { %1491 = vmatpush.msrb.mxu1 %v1936_v17  ;;  %v1644_v17 = vld [vmem:[%s3202_s21 + $0x58] sm:$0xff] }
 0x4fe   : > { %1492 = vmatpush.msrb.mxu1 %v1935_v18  ;;  %v1659_v18 = vld [vmem:[%s3203_s22 + $0x50] sm:$0xff] }
 0x500   : > { %1493 = vmatpush.msrb.mxu1 %v1934_v19  ;;  %v1643_v19 = vld [vmem:[%s3202_s21 + $0x50] sm:$0xff] }
 0x502   : > { %1494 = vmatpush.msrb.mxu1 %v1933_v20  ;;  %v1658_v20 = vld [vmem:[%s3203_s22 + $0x48] sm:$0xff] }
 0x504   : > { %1495 = vmatpush.msrb.mxu1 %v1932_v21  ;;  %v1642_v21 = vld [vmem:[%s3202_s21 + $0x48] sm:$0xff] }
 0x506   : > { %1496 = vmatpush.msrb.mxu1 %v1931_v22  ;;  %v1657_v22 = vld [vmem:[%s3203_s22 + $0x40] sm:$0xff] }
 0x508   : > { %1497 = vmatpush.msrb.mxu1 %v1930_v23  ;;  %v1641_v23 = vld [vmem:[%s3202_s21 + $0x40] sm:$0xff] }
 0x50a   : > { %1498 = vmatpush.msrb.mxu1 %v1929_v24  ;;  %v1656_v24 = vld [vmem:[%s3203_s22 + $0x38] sm:$0xff] }
 0x50c   : > { %1499 = vmatpush.msrb.mxu1 %v1928_v32  ;;  %v1652_v32 = vld [vmem:[%s3203_s22 + $0x18] sm:$0xff] }
 0x576   : > { %v1309_v33 = vpop.f32.mrf.mxu1 }
 0x577   : > { %v1310_v34 = vadd.f32 %v1994_v30, %v1309_v33  ;;  %v1927_v33 = vld [vmem:[%s3198_s17 + $0x90] sm:$0xff] }
 0x578   : > { %1500 = vmatpush.msrb.mxu1 %v1927_v33  ;;  %v1636_v33 = vld [vmem:[%s3202_s21 + $0x18] sm:$0xff] }
 0x579   : > { %v1312_v36 = vadd.f32 %v1310_v34, %v2323_v59  ;;  %v1957_v59 = vld [vmem:[%s3197_s16 + $0xf0] sm:$0xff]  ;;  %v1926_v34 = vld [vmem:[%s3198_s17 + $0x88] sm:$0xff] }
 0x57a   : > { %1545 = vmatpush.msrb.mxu3 %v1957_v59  ;;  %1501 = vmatpush.msrb.mxu1 %v1926_v34  ;;  %v1651_v34 = vld [vmem:[%s3203_s22 + $0x10] sm:$0xff] }
 0x57b   : > { %v1314_v38 = vmul.f32 0.01, %v1312_v36  ;;  %vm1313_vm8 = vcmp.ge.f32.partialorder %v1312_v36, 0.0 }
 0x57c   : > { %1546 = vmatpush.msrb.mxu3 %v1956_v43  ;;  %1502 = vmatpush.msrb.mxu1 %v1925_v35  ;;  %v1974_v43 = vld [vmem:[%s3200_s19 + $0xf8] sm:$0xff]  ;;  %v1635_v35 = vld [vmem:[%s3202_s21 + $0x10] sm:$0xff] }
 0x57d   : > { %v2756_v42 = vsel %vm1313_vm8, %v1312_v36, %v1314_v38  ;;  %v1996_v36 = vld [vmem:[%s3196_s15 + $0x1] ss:$0 sm:$0xff]  ;;  %1589 = vmatpush.msra.mxu0 %v1974_v43  ;;  %v1728_v43 = vld [vmem:[%s3205_s24 + $0x78] sm:$0xff] }
 0x57e   : > { %1331 = vmatpush.msra.mxu2 %v2756_v42  ;;  %1547 = vmatpush.msrb.mxu3 %v1955_v45  ;;  %v1973_v45 = vld [vmem:[%s3200_s19 + $0xf0] sm:$0xff] }
 0x57f   : > { %1874 = vmatmul.msk.f32.vlgmr.msra.gmra.mxu2 %vm866_vm0, %v2321_v58  ;;  %1590 = vmatpush.msra.mxu0 %v1973_v45  ;;  %v1727_v45 = vld [vmem:[%s3205_s24 + $0x70] sm:$0xff] }
 0x580   : > { %1548 = vmatpush.msrb.mxu3 %v1954_v46  ;;  %1441 = vmatpush.msrb.mxu2 %v1923_v60  ;;  %v1972_v46 = vld [vmem:[%s3200_s19 + $0xe8] sm:$0xff] }
 0x581   : > { %1591 = vmatpush.msra.mxu0 %v1972_v46  ;;  %v1725_v46 = vld [vmem:[%s3205_s24 + $0x60] sm:$0xff] }
 0x582   : > { %1549 = vmatpush.msrb.mxu3 %v1953_v47  ;;  %1442 = vmatpush.msrb.mxu2 %v1922_v61  ;;  %v1970_v47 = vld [vmem:[%s3200_s19 + $0xd8] sm:$0xff]  ;;  %v1961_v61 = vld [vmem:[%s3200_s19 + $0x90] sm:$0xff] }
 0x584   : > { %1550 = vmatpush.msrb.mxu3 %v1952_v48  ;;  %1443 = vmatpush.msrb.mxu2 %v1921_v62  ;;  %v1969_v48 = vld [vmem:[%s3200_s19 + $0xd0] sm:$0xff]  ;;  %v1960_v62 = vld [vmem:[%s3200_s19 + $0x88] sm:$0xff] }
 0x586   : > { %1551 = vmatpush.msrb.mxu3 %v1951_v49  ;;  %1444 = vmatpush.msrb.mxu2 %v1920_v63  ;;  %v1968_v49 = vld [vmem:[%s3200_s19 + $0xc8] sm:$0xff]  ;;  %v1959_v63 = vld [vmem:[%s3200_s19 + $0x80] sm:$0xff] }
 0x588   : > { %1552 = vmatpush.msrb.mxu3 %v1950_v50  ;;  %1445 = vmatpush.msrb.mxu2 %v1919_v0  ;;  %v1967_v50 = vld [vmem:[%s3200_s19 + $0xc0] sm:$0xff] }
 0x58a   : > { %1553 = vmatpush.msrb.mxu3 %v1949_v51  ;;  %1446 = vmatpush.msrb.mxu2 %v1918_v1  ;;  %v1966_v51 = vld [vmem:[%s3200_s19 + $0xb8] sm:$0xff] }
 0x58c   : > { %1554 = vmatpush.msrb.mxu3 %v1948_v52  ;;  %1447 = vmatpush.msrb.mxu2 %v1917_v2  ;;  %v1965_v52 = vld [vmem:[%s3200_s19 + $0xb0] sm:$0xff] }
 0x58e   : > { %1555 = vmatpush.msrb.mxu3 %v1947_v53  ;;  %1448 = vmatpush.msrb.mxu2 %v1916_v3  ;;  %v1964_v53 = vld [vmem:[%s3200_s19 + $0xa8] sm:$0xff] }
 0x590   : > { %1556 = vmatpush.msrb.mxu3 %v1946_v54  ;;  %1449 = vmatpush.msrb.mxu2 %v1915_v4  ;;  %v1963_v54 = vld [vmem:[%s3200_s19 + $0xa0] sm:$0xff] }
 0x591   : > { %v1998_v4 = vld [vmem:[%s3201_s20 + $0x1] ss:$0 sm:$0xff] }
 0x592   : > { %1557 = vmatpush.msrb.mxu3 %v1945_v55  ;;  %1450 = vmatpush.msrb.mxu2 %v1914_v5  ;;  %v1962_v55 = vld [vmem:[%s3200_s19 + $0x98] sm:$0xff] }
 0x594   : > { %1558 = vmatpush.msrb.mxu3 %v1944_v56  ;;  %1451 = vmatpush.msrb.mxu2 %v1913_v6  ;;  %v1997_v56 = vld [vmem:[%s3199_s18 + $0x1] ss:$0 sm:$0xff] }
 0x596   : > { %1559 = vmatpush.msrb.mxu3 %v1943_v57  ;;  %1452 = vmatpush.msrb.mxu2 %v1912_v7 }
 0x598   : > { %1453 = vmatpush.msrb.mxu2 %v1911_v9 }
 0x59a   : > { %1454 = vmatpush.msrb.mxu2 %v1910_v10  ;;  %v1664_v10 = vld [vmem:[%s3203_s22 + $0x78] sm:$0xff] }
 0x59c   : > { %1455 = vmatpush.msrb.mxu2 %v1909_v11  ;;  %v1663_v11 = vld [vmem:[%s3203_s22 + $0x70] sm:$0xff] }
 0x59e   : > { %1456 = vmatpush.msrb.mxu2 %v1908_v12  ;;  %v1648_v12 = vld [vmem:[%s3202_s21 + $0x78] sm:$0xff] }
 0x59f   : > { %1685 = vmatpush.msra.mxu1 %v1648_v12 }
 0x602   : > { %v1333_v8 = vpop.f32.mrf.mxu2 }
 0x603   : > { %1406 = vmatmul.f32.vlgmr.msra.gmra.mxu3 %v1333_v8 }
 0x604   : > { %1733 = vmatpush.msra.mxu3 %v1728_v43 }
 0x606   : > { %1734 = vmatpush.msra.mxu3 %v1727_v45 }
 0x60b   : > { %1560 = vmatmul.f32.vlgmr.msrb.gmra.mxu3 %v2756_v42 }
 0x686   : > { %v1407_v27 = vpop.f32.mrf.mxu3 }
 0x687   : > { %v1408_v28 = vadd.f32 %v1407_v27, %v1387_v26  ;;  %v1655_v26 = vld [vmem:[%s3203_s22 + $0x30] sm:$0xff] }
 0x688   : > { %v1639_v27 = vld [vmem:[%s3202_s21 + $0x30] sm:$0xff] }
 0x689   : > { %v1415_v29 = vadd.f32 %v1995_v25, %v1408_v28  ;;  %v1640_v25 = vld [vmem:[%s3202_s21 + $0x38] sm:$0xff]  ;;  %v1654_v28 = vld [vmem:[%s3203_s22 + $0x28] sm:$0xff] }
 0x68b   : > { %v1417_v30 = vmul.f32 0.01, %v1415_v29  ;;  %vm1416_vm9 = vcmp.ge.f32.partialorder %v1415_v29, 0.0 }
 0x68d   : > { %v1418_v31 = vsel %vm1416_vm9, %v1415_v29, %v1417_v30  ;;  %v1638_v29 = vld [vmem:[%s3202_s21 + $0x28] sm:$0xff]  ;;  %v1653_v30 = vld [vmem:[%s3203_s22 + $0x20] sm:$0xff] }
 0x68e   : > { %1457 = vmatmul.f32.vlgmr.msrb.gmra.mxu2 %v1418_v31  ;;  %v1561_v0 = vpop.f32.mrf.mxu3  ;;  %v1637_v31 = vld [vmem:[%s3202_s21 + $0x20] sm:$0xff] }
 0x711   : > { %v1458_v37 = vpop.f32.mrf.mxu2 }
 0x712   : > { %v1459_v38 = vadd.f32 %v1996_v36, %v1458_v37  ;;  %v1650_v36 = vld [vmem:[%s3203_s22 + $0x8] sm:$0xff] }
 0x713   : > { %v1634_v37 = vld [vmem:[%s3202_s21 + $0x8] sm:$0xff] }
 0x714   : > { %v1461_v40 = vadd.f32 %v1459_v38, %v2590_v39  ;;  %v1971_v39 = vld [vmem:[%s3200_s19 + $0xe0] sm:$0xff] }
 0x715   : > { %1592 = vmatpush.msra.mxu0 %v1971_v39  ;;  %v1649_v38 = vld [vmem:[%s3203_s22] sm:$0xff]  ;;  %v1724_v39 = vld [vmem:[%s3205_s24 + $0x58] sm:$0xff] }
 0x716   : > { %v1463_v41 = vmul.f32 0.01, %v1461_v40  ;;  %vm1462_vm10 = vcmp.ge.f32.partialorder %v1461_v40, 0.0 }
 0x717   : > { %1593 = vmatpush.msra.mxu0 %v1970_v47  ;;  %v1723_v47 = vld [vmem:[%s3205_s24 + $0x50] sm:$0xff] }
 0x718   : > { %v2910_v59 = vsel %vm1462_vm10, %v1461_v40, %v1463_v41  ;;  %v1633_v40 = vld [vmem:[%s3202_s21] sm:$0xff] }
 0x719   : > { %1503 = vmatmul.f32.vlgmr.msrb.gmra.mxu1 %v2910_v59  ;;  %1594 = vmatpush.msra.mxu0 %v1969_v48  ;;  %v1722_v48 = vld [vmem:[%s3205_s24 + $0x48] sm:$0xff] }
 0x71b   : > { %1595 = vmatpush.msra.mxu0 %v1968_v49  ;;  %v1721_v49 = vld [vmem:[%s3205_s24 + $0x40] sm:$0xff] }
 0x71d   : > { %1596 = vmatpush.msra.mxu0 %v1967_v50  ;;  %v1720_v50 = vld [vmem:[%s3205_s24 + $0x38] sm:$0xff] }
 0x71f   : > { %1597 = vmatpush.msra.mxu0 %v1966_v51  ;;  %v1719_v51 = vld [vmem:[%s3205_s24 + $0x30] sm:$0xff] }
 0x721   : > { %1598 = vmatpush.msra.mxu0 %v1965_v52  ;;  %v1718_v52 = vld [vmem:[%s3205_s24 + $0x28] sm:$0xff] }
 0x723   : > { %1599 = vmatpush.msra.mxu0 %v1964_v53  ;;  %v1717_v53 = vld [vmem:[%s3205_s24 + $0x20] sm:$0xff] }
 0x725   : > { %1600 = vmatpush.msra.mxu0 %v1963_v54  ;;  %v1716_v54 = vld [vmem:[%s3205_s24 + $0x18] sm:$0xff] }
 0x727   : > { %1601 = vmatpush.msra.mxu0 %v1962_v55  ;;  %v1715_v55 = vld [vmem:[%s3205_s24 + $0x10] sm:$0xff] }
 0x729   : > { %1602 = vmatpush.msra.mxu0 %v1961_v61  ;;  %v1771_v61 = vld [vmem:[%s3207_s26 + $0x70] sm:$0xff] }
 0x72b   : > { %1603 = vmatpush.msra.mxu0 %v1960_v62  ;;  %v1770_v62 = vld [vmem:[%s3207_s26 + $0x68] sm:$0xff] }
 0x72d   : > { %1604 = vmatpush.msra.mxu0 %v1959_v63  ;;  %v1769_v63 = vld [vmem:[%s3207_s26 + $0x60] sm:$0xff] }
 0x796   : > { %v1504_v57 = vpop.f32.mrf.mxu1 }
 0x797   : > { %v1505_v60 = vadd.f32 %v1997_v56, %v1504_v57  ;;  %v1714_v56 = vld [vmem:[%s3205_s24 + $0x8] sm:$0xff]  ;;  %v1713_v57 = vld [vmem:[%s3205_s24] sm:$0xff] }
 0x799   : > { %1522 = vmatpush.msra.mxu2 %v1505_v60  ;;  %v1772_v60 = vld [vmem:[%s3207_s26 + $0x78] sm:$0xff] }
 0x79a   : > { %1942 = vmatmul.msk.f32.vlgmr.msra.gmra.mxu2 %vm866_vm0, %v2603_v44  ;;  %1777 = vmatpush.msrb.mxu0 %v1772_v60 }
 0x79c   : > { %1778 = vmatpush.msrb.mxu0 %v1771_v61 }
 0x79e   : > { %1779 = vmatpush.msrb.mxu0 %v1770_v62 }
 0x7a0   : > { %1780 = vmatpush.msrb.mxu0 %v1769_v63 }
 0x81d   : > { %v1524_v1 = vpop.f32.mrf.mxu2 }
 0x81e   : > { %v1562_v2 = vadd.f32 %v1561_v0, %v1524_v1  ;;  %v1768_v0 = vld [vmem:[%s3207_s26 + $0x58] sm:$0xff]  ;;  %v1767_v1 = vld [vmem:[%s3207_s26 + $0x50] sm:$0xff] }
 0x81f   : > { %1781 = vmatpush.msrb.mxu0 %v1768_v0 }
 0x820   : > { %vm1564_vm11 = vcmp.ge.f32.partialorder %v1562_v2, 0.0  ;;  %v1565_v44 = vmul.f32 0.01, %v1562_v2 }
 0x821   : > { %1782 = vmatpush.msrb.mxu0 %v1767_v1 }
 0x822   : > { %v1566_v3 = vsel %vm1564_vm11, %v1562_v2, %v1565_v44  ;;  %v1766_v2 = vld [vmem:[%s3207_s26 + $0x48] sm:$0xff]  ;;  %v1765_v44 = vld [vmem:[%s3207_s26 + $0x40] sm:$0xff] }
 0x823   : > { %1605 = vmatmul.f32.vlgmr.msra.gmra.mxu0 %v1566_v3  ;;  %v1764_v3 = vld [vmem:[%s3207_s26 + $0x38] sm:$0xff] }
 0x824   : > { %1783 = vmatpush.msrb.mxu0 %v1766_v2 }
 0x826   : > { %1784 = vmatpush.msrb.mxu0 %v1765_v44 }
 0x828   : > { %1785 = vmatpush.msrb.mxu0 %v1764_v3 }
 0x8a0   : > { %v1606_v5 = vpop.f32.mrf.mxu0 }
 0x8a1   : > { %v1607_v6 = vadd.f32 %v1998_v4, %v1606_v5  ;;  %v1763_v4 = vld [vmem:[%s3207_s26 + $0x30] sm:$0xff]  ;;  %v1762_v5 = vld [vmem:[%s3207_s26 + $0x28] sm:$0xff] }
 0x8a2   : > { %1786 = vmatpush.msrb.mxu0 %v1763_v4 }
 0x8a3   : > { %v1609_v7 = vadd.f32 %v1607_v6, %v2756_v42  ;;  %v1647_v42 = vld [vmem:[%s3202_s21 + $0x70] sm:$0xff]  ;;  %v1761_v6 = vld [vmem:[%s3207_s26 + $0x20] sm:$0xff] }
 0x8a4   : > { %1686 = vmatpush.msra.mxu1 %v1647_v42  ;;  %1787 = vmatpush.msrb.mxu0 %v1762_v5 }
 0x8a5   : > { %v1611_v8 = vmul.f32 0.01, %v1609_v7  ;;  %vm1610_vm12 = vcmp.ge.f32.partialorder %v1609_v7, 0.0 }
 0x8a6   : > { %1788 = vmatpush.msrb.mxu0 %v1761_v6 }
 0x8a7   : > { %v1612_v9 = vsel %vm1610_vm12, %v1609_v7, %v1611_v8  ;;  %v1999_v7 = vld [vmem:[%s3204_s23] ss:$0 sm:$0xff] }
 0x8a8   : > { %1628 = vmatpush.msrb.mxu2 %v1612_v9 }
 0x8a9   : > { %1976 = vmatmul.msk.f32.vlgmr.msrb.gmra.mxu2 %vm866_vm0, %v2321_v58  ;;  %v1646_v58 = vld [vmem:[%s3202_s21 + $0x68] sm:$0xff] }
 0x8aa   : > { %1665 = vmatpush.msra.mxu2 %v1664_v10  ;;  %1687 = vmatpush.msra.mxu1 %v1646_v58  ;;  %v1759_v58 = vld [vmem:[%s3207_s26 + $0x10] sm:$0xff] }
 0x8ac   : > { %1666 = vmatpush.msra.mxu2 %v1663_v11  ;;  %1688 = vmatpush.msra.mxu1 %v1645_v15  ;;  %v1757_v15 = vld [vmem:[%s3207_s26] sm:$0xff] }
 0x8ae   : > { %1667 = vmatpush.msra.mxu2 %v1662_v13  ;;  %1689 = vmatpush.msra.mxu1 %v1644_v17  ;;  %v1760_v13 = vld [vmem:[%s3207_s26 + $0x18] sm:$0xff] }
 0x8af   : > { %1789 = vmatpush.msrb.mxu0 %v1760_v13 }
 0x8b0   : > { %1668 = vmatpush.msra.mxu2 %v1661_v14  ;;  %1690 = vmatpush.msra.mxu1 %v1643_v19  ;;  %v1758_v14 = vld [vmem:[%s3207_s26 + $0x8] sm:$0xff] }
 0x8b1   : > { %1790 = vmatpush.msrb.mxu0 %v1759_v58 }
 0x8b2   : > { %1669 = vmatpush.msra.mxu2 %v1660_v16  ;;  %1691 = vmatpush.msra.mxu1 %v1642_v21  ;;  %v2000_v16 = vld [vmem:[%s3206_s25] ss:$0 sm:$0xff] }
 0x8b3   : > { %1791 = vmatpush.msrb.mxu0 %v1758_v14 }
 0x8b4   : > { %1670 = vmatpush.msra.mxu2 %v1659_v18  ;;  %1692 = vmatpush.msra.mxu1 %v1641_v23 }
 0x8b5   : > { %1792 = vmatpush.msrb.mxu0 %v1757_v15 }
 0x8b6   : > { %1671 = vmatpush.msra.mxu2 %v1658_v20  ;;  %1693 = vmatpush.msra.mxu1 %v1640_v25 }
 0x8b8   : > { %1672 = vmatpush.msra.mxu2 %v1657_v22  ;;  %1694 = vmatpush.msra.mxu1 %v1639_v27  ;;  %v2001_v22 = vld [vmem:[%s3208_s27] ss:$0 sm:$0xff] }
 0x8ba   : > { %1673 = vmatpush.msra.mxu2 %v1656_v24  ;;  %1695 = vmatpush.msra.mxu1 %v1638_v29 }
 0x8bc   : > { %1674 = vmatpush.msra.mxu2 %v1655_v26  ;;  %1696 = vmatpush.msra.mxu1 %v1637_v31 }
 0x8be   : > { %1675 = vmatpush.msra.mxu2 %v1654_v28  ;;  %1697 = vmatpush.msra.mxu1 %v1636_v33 }
 0x8c0   : > { %1676 = vmatpush.msra.mxu2 %v1653_v30  ;;  %1698 = vmatpush.msra.mxu1 %v1635_v35 }
 0x8c2   : > { %1677 = vmatpush.msra.mxu2 %v1652_v32  ;;  %1699 = vmatpush.msra.mxu1 %v1634_v37 }
 0x8c4   : > { %1678 = vmatpush.msra.mxu2 %v1651_v34  ;;  %1700 = vmatpush.msra.mxu1 %v1633_v40 }
 0x8c6   : > { %1679 = vmatpush.msra.mxu2 %v1650_v36 }
 0x8c8   : > { %1680 = vmatpush.msra.mxu2 %v1649_v38 }
 0x8c9   : > { %1681 = vmatmul.f32.vlgmr.msra.gmra.mxu2 %v2910_v59  ;;  %v1726_v59 = vld [vmem:[%s3205_s24 + $0x68] sm:$0xff] }
 0x8ca   : > { %1735 = vmatpush.msra.mxu3 %v1726_v59 }
 0x8cc   : > { %1736 = vmatpush.msra.mxu3 %v1725_v46 }
 0x8ce   : > { %1737 = vmatpush.msra.mxu3 %v1724_v39 }
 0x8d0   : > { %1738 = vmatpush.msra.mxu3 %v1723_v47 }
 0x8d2   : > { %1739 = vmatpush.msra.mxu3 %v1722_v48 }
 0x8d4   : > { %1740 = vmatpush.msra.mxu3 %v1721_v49 }
 0x8d6   : > { %1741 = vmatpush.msra.mxu3 %v1720_v50 }
 0x8d8   : > { %1742 = vmatpush.msra.mxu3 %v1719_v51 }
 0x8da   : > { %1743 = vmatpush.msra.mxu3 %v1718_v52 }
 0x8dc   : > { %1744 = vmatpush.msra.mxu3 %v1717_v53 }
 0x8de   : > { %1745 = vmatpush.msra.mxu3 %v1716_v54 }
 0x8e0   : > { %1746 = vmatpush.msra.mxu3 %v1715_v55 }
 0x8e2   : > { %1747 = vmatpush.msra.mxu3 %v1714_v56 }
 0x8e4   : > { %1748 = vmatpush.msra.mxu3 %v1713_v57 }
 0x92c   : > { %v1630_v41 = vpop.f32.mrf.mxu2 }
 0x92d   : > { %1701 = vmatmul.f32.vlgmr.msra.gmra.mxu1 %v1630_v41 }
 0x94c   : > { %v1682_v8 = vpop.f32.mrf.mxu2 }
 0x9aa   : > { %v1702_v9 = vpop.f32.mrf.mxu1 }
 0x9ab   : > { %v1703_v10 = vadd.f32 %v1702_v9, %v1682_v8 }
 0x9ad   : > { %v1709_v11 = vadd.f32 %v1999_v7, %v1703_v10 }
 0x9af   : > { %v1711_v12 = vmul.f32 0.01, %v1709_v11  ;;  %vm1710_vm13 = vcmp.ge.f32.partialorder %v1709_v11, 0.0 }
 0x9b1   : > { %v1712_v42 = vsel %vm1710_vm13, %v1709_v11, %v1711_v12 }
 0x9b2   : > { %1749 = vmatmul.f32.vlgmr.msra.gmra.mxu3 %v1712_v42 }
 0xa35   : > { %v1750_v17 = vpop.f32.mrf.mxu3 }
 0xa36   : > { %v1751_v18 = vadd.f32 %v2000_v16, %v1750_v17 }
 0xa38   : > { %v1753_v19 = vadd.f32 %v1751_v18, %v1712_v42 }
 0xa3a   : > { %v1755_v20 = vmul.f32 0.01, %v1753_v19  ;;  %vm1754_vm14 = vcmp.ge.f32.partialorder %v1753_v19, 0.0 }
 0xa3c   : > { %v1756_v21 = vsel %vm1754_vm14, %v1753_v19, %v1755_v20 }
 0xa3d   : > { %1793 = vmatmul.f32.vlgmr.msrb.gmra.mxu0 %v1756_v21 }
 0xaba   : > { %v1794_v23 = vpop.f32.mrf.mxu0 }
 0xabb   : > { %v1795_v24 = vadd.f32 %v2001_v22, %v1794_v23 }
 0xabd   : > { %1797 = vst [vmem:[%s857_s30] sm:$0xff] %v1795_v24 }
 0xabe PF: > { %s3245_s8 = sld [smem:[#allocation2_spill]] }
 0xac4   : > { %s38_s8 = sadd.s32 1, %s3245_s8  }
 0xac5   : > { %p35_p4 = scmp.ge.s32.totalorder %s38_s8, 4  }
 0xac7   :  { %37 = sbr.rel (!%p35_p4) target bundleno = 14 (0xe), region = 175 }

</bundles_post_ra>
